<compile_context>
chip_gen: v6e
topology: v6e:2x2x1
jax: 0.10.0
libtpu: 0.0.40
codegen_flags: <defaults>
</compile_context>

<pallas_src>
import numpy as np

import jax
import jax.numpy as jnp
from jax.experimental import pallas as pl
from jax.experimental.pallas import tpu as pltpu

# ---------------- small synthetic GPT-NeoX config ----------------
VOCAB = 50
HIDDEN = 32
N_HEADS = 4
HEAD_DIM = HIDDEN // N_HEADS
N_LAYERS = 2
INTERMEDIATE = 4 * HIDDEN
ROTARY_PCT = 0.25                       # GPT-NeoX default
ROTARY_NDIMS = int(HEAD_DIM * ROTARY_PCT)
ROPE_BASE = 10000.0
LN_EPS = 1e-5
NUM_CLASSES = 3
BATCH = 2
SEQ = 8
NPAD = 128                              # lane-dense padding for the classifier head

_TRANS_B_DN = (((1,), (1,)), ((), ()))  # contract last dims (q @ k^T), MXU-native


# ---------------- rotary constants (host-side, trace-time) ----------------
def _build_rotary_constants():
    """COS/SIN slabs (S, 3H) + sign-permutation matrix P (3H, 3H) so that
    qkv*COS + (qkv @ P)*SIN == GPT-NeoX rotary applied to the q/k rotary columns
    of every head, identity on everything else (pass-through dims and V)."""
    rd, hd = ROTARY_NDIMS, HEAD_DIM
    inv_freq = 1.0 / (ROPE_BASE ** (np.arange(0, rd, 2, dtype=np.float32) / rd))
    t = np.arange(SEQ, dtype=np.float32)
    freqs = np.outer(t, inv_freq)                     # (S, rd/2)
    emb = np.concatenate([freqs, freqs], axis=-1)     # (S, rd)
    cos_t, sin_t = np.cos(emb), np.sin(emb)

    cos_slab = np.ones((SEQ, 3 * HIDDEN), np.float32)
    sin_slab = np.zeros((SEQ, 3 * HIDDEN), np.float32)
    rot_p = np.zeros((3 * HIDDEN, 3 * HIDDEN), np.float32)
    half = rd // 2
    for hh in range(N_HEADS):
        base = hh * 3 * hd
        for off in (0, hd):                           # rotary columns of q and of k
            cols = base + off + np.arange(rd)
            cos_slab[:, cols] = cos_t
            sin_slab[:, cols] = sin_t
            for j in range(half):
                # rotate_half(x)[j] = -x[j+half] ; rotate_half(x)[j+half] = x[j]
                rot_p[cols[j + half], cols[j]] = -1.0
                rot_p[cols[j], cols[j + half]] = 1.0
    return cos_slab, sin_slab, rot_p


_ROT_COS, _ROT_SIN, _ROT_P = _build_rotary_constants()


# ---------------- the fused Pallas kernel ----------------
def _gpt_neox_fused_kernel(h_ref, cos_ref, sin_ref, rotp_ref,
                           ln1_g_ref, ln1_b_ref, ln2_g_ref, ln2_b_ref,
                           qkv_w_ref, qkv_b_ref, dense_w_ref, dense_b_ref,
                           w1_ref, b1_ref, w2_ref, b2_ref,
                           fln_g_ref, fln_b_ref, fc1_w_ref, fc1_b_ref,
                           o_ref):
    f32 = jnp.float32
    scale = 1.0 / float(HEAD_DIM) ** 0.5

    def ln(x, g, b):
        mu = jnp.mean(x, axis=-1, keepdims=True)
        var = jnp.mean(jnp.square(x - mu), axis=-1, keepdims=True)
        return (x - mu) * jax.lax.rsqrt(var + LN_EPS) * g + b

    def erf_poly(x):
        # Abramowitz & Stegun 7.1.26, |err| <= 1.5e-7 — in-kernel exact-GELU erf.
        # TODO(synk): swap to lax.erf if/when Mosaic guarantees an erf lowering.
        ax = jnp.abs(x)
        t = 1.0 / (1.0 + 0.3275911 * ax)
        poly = ((((1.061405429 * t - 1.453152027) * t + 1.421413741) * t
                 - 0.284496736) * t + 0.254829592) * t
        y = 1.0 - poly * jnp.exp(-ax * ax)
        return jnp.where(x < 0.0, -y, y)

    def gelu_exact(x):
        return 0.5 * x * (1.0 + erf_poly(x * 0.7071067811865476))

    # Causal mask, hoisted once (attention_mask in the PyTorch forward is all-ones,
    # so only the GPT-NeoX causal mask is active).
    row_ids = jax.lax.broadcasted_iota(jnp.int32, (SEQ, SEQ), 0)
    col_ids = jax.lax.broadcasted_iota(jnp.int32, (SEQ, SEQ), 1)
    causal = col_ids <= row_ids
    neg_big = jnp.finfo(f32).min

    cosv = cos_ref[...]                                 # (S, 3H)
    sinv = sin_ref[...]
    rot_p = rotp_ref[...]                               # (3H, 3H)

    h = h_ref[...]                                      # (S, H) — this program's sequence
    for layer in range(N_LAYERS):
        # ---- attention branch: LN1 -> QKV -> rotary -> causal softmax -> dense ----
        h1 = ln(h, ln1_g_ref[layer], ln1_b_ref[layer])
        qkv = jnp.dot(h1, qkv_w_ref[layer], preferred_element_type=f32) + qkv_b_ref[layer]
        # rotary on the whole (S, 3H) slab: qkv*cos + rotate_half(qkv)*sin
        qkv = qkv * cosv + jnp.dot(qkv, rot_p, preferred_element_type=f32) * sinv

        dw = dense_w_ref[layer]                          # (H, H)
        attn_acc = jnp.zeros((SEQ, HIDDEN), f32)
        for hh in range(N_HEADS):
            base = hh * 3 * HEAD_DIM
            q = qkv[:, base:base + HEAD_DIM]             # (S, HD)
            k = qkv[:, base + HEAD_DIM:base + 2 * HEAD_DIM]
            v = qkv[:, base + 2 * HEAD_DIM:base + 3 * HEAD_DIM]
            s = jax.lax.dot_general(q, k, _TRANS_B_DN,
                                    preferred_element_type=f32) * scale
            s = jnp.where(causal, s, neg_big)
            s = s - jnp.max(s, axis=-1, keepdims=True)
            p = jnp.exp(s)
            denom = jnp.sum(p, axis=-1, keepdims=True)
            out_h = (jnp.dot(p, v, preferred_element_type=f32)
                     * pl.reciprocal(denom, approx=True))
            # head-concat + dense proj fused: sum_h out_h @ dense_w[rows of head h]
            attn_acc = attn_acc + jnp.dot(
                out_h, dw[hh * HEAD_DIM:(hh + 1) * HEAD_DIM, :],
                preferred_element_type=f32)
        attn_out = attn_acc + dense_b_ref[layer]

        # ---- MLP branch (parallel residual): LN2 -> W1 -> GELU -> W2 ----
        h2 = ln(h, ln2_g_ref[layer], ln2_b_ref[layer])
        mid = jnp.dot(h2, w1_ref[layer], preferred_element_type=f32) + b1_ref[layer]
        mlp_out = jnp.dot(gelu_exact(mid), w2_ref[layer],
                          preferred_element_type=f32) + b2_ref[layer]

        h = h + attn_out + mlp_out                      # x + attn(ln1 x) + mlp(ln2 x)

    # final LN, then flatten(S*H) @ fc1 folded into a sum of per-position matmuls
    hf = ln(h, fln_g_ref[...], fln_b_ref[...])           # (S, H)
    logits = fc1_b_ref[...]                              # (1, NPAD), lane-dense
    for s_idx in range(SEQ):
        w_s = fc1_w_ref[s_idx * HIDDEN:(s_idx + 1) * HIDDEN, :]     # (H, NPAD)
        logits = logits + jnp.dot(hf[s_idx:s_idx + 1, :], w_s,
                                  preferred_element_type=f32)
    o_ref[0] = logits


# ---------------- wrapper ----------------
def forward(params, input_ids):
    """SimpleGPT2SequenceClassifier.forward(input_id) -> (B, NUM_CLASSES)."""
    B, S = input_ids.shape

    # TODO(synk): embedding row-gather stays as one XLA op (data-dependent gather).
    h0 = jnp.take(params['embed'], input_ids.reshape(-1), axis=0)       # (B*S, H)

    rot_cos = jnp.asarray(_ROT_COS)
    rot_sin = jnp.asarray(_ROT_SIN)
    rot_p = jnp.asarray(_ROT_P)

    # Lane-dense classifier head: pad NUM_CLASSES (3) up to 128 output lanes.
    fc1_w = jnp.zeros((S * HIDDEN, NPAD), jnp.float32).at[:, :NUM_CLASSES].set(params['fc1_w'])
    fc1_b = jnp.zeros((1, NPAD), jnp.float32).at[0, :NUM_CLASSES].set(params['fc1_b'])

    weight_args = (params['ln1_g'], params['ln1_b'], params['ln2_g'], params['ln2_b'],
                   params['qkv_w'], params['qkv_b'], params['dense_w'], params['dense_b'],
                   params['w1'], params['b1'], params['w2'], params['b2'],
                   params['final_ln_g'], params['final_ln_b'], fc1_w, fc1_b)

    def _const_spec(shape):
        if len(shape) == 2:
            return pl.BlockSpec(shape, lambda b: (0, 0))
        return pl.BlockSpec(shape, lambda b: (0, 0, 0))

    in_specs = ([pl.BlockSpec((SEQ, HIDDEN), lambda b: (b, 0))]          # per-sequence rows
                + [_const_spec(rot_cos.shape), _const_spec(rot_sin.shape),
                   _const_spec(rot_p.shape)]
                + [_const_spec(w.shape) for w in weight_args])

    out = pl.pallas_call(
        _gpt_neox_fused_kernel,
        out_shape=jax.ShapeDtypeStruct((B, 1, NPAD), jnp.float32),
        grid=(B,),
        in_specs=in_specs,
        out_specs=pl.BlockSpec((1, 1, NPAD), lambda b: (b, 0, 0)),
        compiler_params=pltpu.CompilerParams(dimension_semantics=("parallel",)),
    )(h0, rot_cos, rot_sin, rot_p, *weight_args)

    return out.reshape(B, NPAD)[:, :NUM_CLASSES]


# ---------------- deterministic parameter init (stacked per layer) ----------------
def init_params(key):
    def nrm(k, shape, scale=0.02):
        return scale * jax.random.normal(k, shape, jnp.float32)

    keys = jax.random.split(key, 2 + N_LAYERS)
    qkv_w, qkv_b, dense_w, dense_b, w1, b1, w2, b2 = ([] for _ in range(8))
    for l in range(N_LAYERS):
        lk = jax.random.split(keys[2 + l], 8)
        qkv_w.append(nrm(lk[0], (HIDDEN, 3 * HIDDEN)))
        qkv_b.append(nrm(lk[1], (3 * HIDDEN,)).reshape(1, 3 * HIDDEN))
        dense_w.append(nrm(lk[2], (HIDDEN, HIDDEN)))
        dense_b.append(nrm(lk[3], (HIDDEN,)).reshape(1, HIDDEN))
        w1.append(nrm(lk[4], (HIDDEN, INTERMEDIATE)))
        b1.append(nrm(lk[5], (INTERMEDIATE,)).reshape(1, INTERMEDIATE))
        w2.append(nrm(lk[6], (INTERMEDIATE, HIDDEN)))
        b2.append(nrm(lk[7], (HIDDEN,)).reshape(1, HIDDEN))

    return {
        'embed': nrm(keys[0], (VOCAB, HIDDEN)),
        'ln1_g': jnp.ones((N_LAYERS, 1, HIDDEN), jnp.float32),
        'ln1_b': jnp.zeros((N_LAYERS, 1, HIDDEN), jnp.float32),
        'ln2_g': jnp.ones((N_LAYERS, 1, HIDDEN), jnp.float32),
        'ln2_b': jnp.zeros((N_LAYERS, 1, HIDDEN), jnp.float32),
        'qkv_w': jnp.stack(qkv_w), 'qkv_b': jnp.stack(qkv_b),
        'dense_w': jnp.stack(dense_w), 'dense_b': jnp.stack(dense_b),
        'w1': jnp.stack(w1), 'b1': jnp.stack(b1),
        'w2': jnp.stack(w2), 'b2': jnp.stack(b2),
        'final_ln_g': jnp.ones((1, HIDDEN), jnp.float32),
        'final_ln_b': jnp.zeros((1, HIDDEN), jnp.float32),
        'fc1_w': nrm(keys[1], (SEQ * HIDDEN, NUM_CLASSES)),
        'fc1_b': jnp.zeros((NUM_CLASSES,), jnp.float32),
    }


if __name__ == "__main__":
    root = jax.random.PRNGKey(0)
    pkey, ikey = jax.random.split(root)
    params = init_params(pkey)
    input_ids = jax.random.randint(ikey, (BATCH, SEQ), 0, VOCAB, dtype=jnp.int32)

    logits = jax.jit(lambda ids: forward(params, ids))(input_ids)
    logits = jax.block_until_ready(logits)

    assert logits.shape == (BATCH, NUM_CLASSES), logits.shape
    assert logits.dtype == jnp.float32
    print("KERNEL_OK")
</pallas_src>

<mosaic_0001>
module attributes {stable_mosaic.version = 11 : i64} {
  func.func @_gpt_neox_fused_kernel(%arg0: i32, %arg1: memref<8x32xf32, #tpu.memory_space<vmem>>, %arg2: memref<8x96xf32, #tpu.memory_space<vmem>>, %arg3: memref<8x96xf32, #tpu.memory_space<vmem>>, %arg4: memref<96x96xf32, #tpu.memory_space<vmem>>, %arg5: memref<2x1x32xf32, #tpu.memory_space<vmem>>, %arg6: memref<2x1x32xf32, #tpu.memory_space<vmem>>, %arg7: memref<2x1x32xf32, #tpu.memory_space<vmem>>, %arg8: memref<2x1x32xf32, #tpu.memory_space<vmem>>, %arg9: memref<2x32x96xf32, #tpu.memory_space<vmem>>, %arg10: memref<2x1x96xf32, #tpu.memory_space<vmem>>, %arg11: memref<2x32x32xf32, #tpu.memory_space<vmem>>, %arg12: memref<2x1x32xf32, #tpu.memory_space<vmem>>, %arg13: memref<2x32x128xf32, #tpu.memory_space<vmem>>, %arg14: memref<2x1x128xf32, #tpu.memory_space<vmem>>, %arg15: memref<2x128x32xf32, #tpu.memory_space<vmem>>, %arg16: memref<2x1x32xf32, #tpu.memory_space<vmem>>, %arg17: memref<1x32xf32, #tpu.memory_space<vmem>>, %arg18: memref<1x32xf32, #tpu.memory_space<vmem>>, %arg19: memref<256x128xf32, #tpu.memory_space<vmem>>, %arg20: memref<1x128xf32, #tpu.memory_space<vmem>>, %arg21: memref<1x1x128xf32, #tpu.memory_space<vmem>>) attributes {dimension_semantics = [#tpu.dimension_semantics<parallel>], iteration_bounds = array<i64: 2>, scalar_prefetch = 0 : i64, scratch_operands = 0 : i64, tpu.core_type = #tpu.core_type<tc>, window_params = [{transform_indices = @transform_0, window_bounds = array<i64: 8, 32>}, {pipeline_mode = #tpu.pipeline_mode<synchronous>, transform_indices = @transform_1, window_bounds = array<i64: 8, 96>}, {pipeline_mode = #tpu.pipeline_mode<synchronous>, transform_indices = @transform_2, window_bounds = array<i64: 8, 96>}, {pipeline_mode = #tpu.pipeline_mode<synchronous>, transform_indices = @transform_3, window_bounds = array<i64: 96, 96>}, {pipeline_mode = #tpu.pipeline_mode<synchronous>, transform_indices = @transform_4, window_bounds = array<i64: 2, 1, 32>}, {pipeline_mode = #tpu.pipeline_mode<synchronous>, transform_indices = @transform_5, window_bounds = array<i64: 2, 1, 32>}, {pipeline_mode = #tpu.pipeline_mode<synchronous>, transform_indices = @transform_6, window_bounds = array<i64: 2, 1, 32>}, {pipeline_mode = #tpu.pipeline_mode<synchronous>, transform_indices = @transform_7, window_bounds = array<i64: 2, 1, 32>}, {pipeline_mode = #tpu.pipeline_mode<synchronous>, transform_indices = @transform_8, window_bounds = array<i64: 2, 32, 96>}, {pipeline_mode = #tpu.pipeline_mode<synchronous>, transform_indices = @transform_9, window_bounds = array<i64: 2, 1, 96>}, {pipeline_mode = #tpu.pipeline_mode<synchronous>, transform_indices = @transform_10, window_bounds = array<i64: 2, 32, 32>}, {pipeline_mode = #tpu.pipeline_mode<synchronous>, transform_indices = @transform_11, window_bounds = array<i64: 2, 1, 32>}, {pipeline_mode = #tpu.pipeline_mode<synchronous>, transform_indices = @transform_12, window_bounds = array<i64: 2, 32, 128>}, {pipeline_mode = #tpu.pipeline_mode<synchronous>, transform_indices = @transform_13, window_bounds = array<i64: 2, 1, 128>}, {pipeline_mode = #tpu.pipeline_mode<synchronous>, transform_indices = @transform_14, window_bounds = array<i64: 2, 128, 32>}, {pipeline_mode = #tpu.pipeline_mode<synchronous>, transform_indices = @transform_15, window_bounds = array<i64: 2, 1, 32>}, {pipeline_mode = #tpu.pipeline_mode<synchronous>, transform_indices = @transform_16, window_bounds = array<i64: 1, 32>}, {pipeline_mode = #tpu.pipeline_mode<synchronous>, transform_indices = @transform_17, window_bounds = array<i64: 1, 32>}, {pipeline_mode = #tpu.pipeline_mode<synchronous>, transform_indices = @transform_18, window_bounds = array<i64: 256, 128>}, {pipeline_mode = #tpu.pipeline_mode<synchronous>, transform_indices = @transform_19, window_bounds = array<i64: 1, 128>}, {transform_indices = @transform_20, window_bounds = array<i64: 1, 1, 128>}]} {
    %0 = tpu.iota {dimensions = array<i32: 0>} : vector<8x8xi32>
    %1 = tpu.iota {dimensions = array<i32: 1>} : vector<8x8xi32>
    %2 = arith.cmpi sle, %1, %0 : vector<8x8xi32>
    %c0 = arith.constant 0 : index
    %c0_0 = arith.constant 0 : index
    %3 = vector.load %arg2[%c0, %c0_0] : memref<8x96xf32, #tpu.memory_space<vmem>>, vector<8x96xf32>
    %c0_1 = arith.constant 0 : index
    %c0_2 = arith.constant 0 : index
    %4 = vector.load %arg3[%c0_1, %c0_2] : memref<8x96xf32, #tpu.memory_space<vmem>>, vector<8x96xf32>
    %c0_3 = arith.constant 0 : index
    %c0_4 = arith.constant 0 : index
    %5 = vector.load %arg4[%c0_3, %c0_4] : memref<96x96xf32, #tpu.memory_space<vmem>>, vector<96x96xf32>
    %c0_5 = arith.constant 0 : index
    %c0_6 = arith.constant 0 : index
    %6 = vector.load %arg1[%c0_5, %c0_6] : memref<8x32xf32, #tpu.memory_space<vmem>>, vector<8x32xf32>
    %c0_7 = arith.constant 0 : index
    %c0_8 = arith.constant 0 : index
    %c0_9 = arith.constant 0 : index
    %7 = vector.load %arg5[%c0_7, %c0_8, %c0_9] : memref<2x1x32xf32, #tpu.memory_space<vmem>>, vector<1x1x32xf32>
    %8 = vector.shape_cast %7 : vector<1x1x32xf32> to vector<1x32xf32>
    %c0_10 = arith.constant 0 : index
    %c0_11 = arith.constant 0 : index
    %c0_12 = arith.constant 0 : index
    %9 = vector.load %arg6[%c0_10, %c0_11, %c0_12] : memref<2x1x32xf32, #tpu.memory_space<vmem>>, vector<1x1x32xf32>
    %10 = vector.shape_cast %9 : vector<1x1x32xf32> to vector<1x32xf32>
    %cst = arith.constant dense<0.000000e+00> : vector<8xf32>
    %11 = vector.multi_reduction <add>, %6, %cst [1] : vector<8x32xf32> to vector<8xf32>
    %12 = vector.shape_cast %11 : vector<8xf32> to vector<8x1xf32>
    %cst_13 = arith.constant 3.200000e+01 : f32
    %13 = vector.broadcast %cst_13 : f32 to vector<8x1xf32>
    %14 = arith.divf %12, %13 : vector<8x1xf32>
    %15 = vector.broadcast %14 : vector<8x1xf32> to vector<8x32xf32>
    %16 = arith.subf %6, %15 : vector<8x32xf32>
    %17 = arith.mulf %16, %16 : vector<8x32xf32>
    %cst_14 = arith.constant dense<0.000000e+00> : vector<8xf32>
    %18 = vector.multi_reduction <add>, %17, %cst_14 [1] : vector<8x32xf32> to vector<8xf32>
    %19 = vector.shape_cast %18 : vector<8xf32> to vector<8x1xf32>
    %cst_15 = arith.constant 3.200000e+01 : f32
    %20 = vector.broadcast %cst_15 : f32 to vector<8x1xf32>
    %21 = arith.divf %19, %20 : vector<8x1xf32>
    %22 = vector.broadcast %14 : vector<8x1xf32> to vector<8x32xf32>
    %23 = arith.subf %6, %22 : vector<8x32xf32>
    %cst_16 = arith.constant 9.99999974E-6 : f32
    %24 = vector.broadcast %cst_16 : f32 to vector<8x1xf32>
    %25 = arith.addf %21, %24 : vector<8x1xf32>
    %26 = math.rsqrt %25 : vector<8x1xf32>
    %27 = vector.broadcast %26 : vector<8x1xf32> to vector<8x32xf32>
    %28 = arith.mulf %23, %27 : vector<8x32xf32>
    %29 = vector.broadcast %8 : vector<1x32xf32> to vector<8x32xf32>
    %30 = arith.mulf %28, %29 : vector<8x32xf32>
    %31 = vector.broadcast %10 : vector<1x32xf32> to vector<8x32xf32>
    %32 = arith.addf %30, %31 : vector<8x32xf32>
    %c0_17 = arith.constant 0 : index
    %c0_18 = arith.constant 0 : index
    %c0_19 = arith.constant 0 : index
    %33 = vector.load %arg9[%c0_17, %c0_18, %c0_19] : memref<2x32x96xf32, #tpu.memory_space<vmem>>, vector<1x32x96xf32>
    %34 = vector.shape_cast %33 : vector<1x32x96xf32> to vector<32x96xf32>
    %cst_20 = arith.constant dense<0.000000e+00> : vector<8x96xf32>
    %35 = tpu.matmul %32, %34, %cst_20 {dimension_numbers = #tpu.dot_dimension_numbers<[1], [0], [0], [1], [0, 0, 1, 1], [], []>} : vector<8x32xf32>, vector<32x96xf32>, vector<8x96xf32> -> vector<8x96xf32>
    %c0_21 = arith.constant 0 : index
    %c0_22 = arith.constant 0 : index
    %c0_23 = arith.constant 0 : index
    %36 = vector.load %arg10[%c0_21, %c0_22, %c0_23] : memref<2x1x96xf32, #tpu.memory_space<vmem>>, vector<1x1x96xf32>
    %37 = vector.shape_cast %36 : vector<1x1x96xf32> to vector<1x96xf32>
    %38 = vector.broadcast %37 : vector<1x96xf32> to vector<8x96xf32>
    %39 = arith.addf %35, %38 : vector<8x96xf32>
    %40 = arith.mulf %39, %3 : vector<8x96xf32>
    %cst_24 = arith.constant dense<0.000000e+00> : vector<8x96xf32>
    %41 = tpu.matmul %39, %5, %cst_24 {dimension_numbers = #tpu.dot_dimension_numbers<[1], [0], [0], [1], [0, 0, 1, 1], [], []>} : vector<8x96xf32>, vector<96x96xf32>, vector<8x96xf32> -> vector<8x96xf32>
    %42 = arith.mulf %41, %4 : vector<8x96xf32>
    %43 = arith.addf %40, %42 : vector<8x96xf32>
    %c0_25 = arith.constant 0 : index
    %c0_26 = arith.constant 0 : index
    %c0_27 = arith.constant 0 : index
    %44 = vector.load %arg11[%c0_25, %c0_26, %c0_27] : memref<2x32x32xf32, #tpu.memory_space<vmem>>, vector<1x32x32xf32>
    %45 = vector.shape_cast %44 : vector<1x32x32xf32> to vector<32x32xf32>
    %cst_28 = arith.constant 0.000000e+00 : f32
    %46 = vector.broadcast %cst_28 : f32 to vector<8x32xf32>
    %47 = vector.extract_strided_slice %43 {offsets = [0, 0], sizes = [8, 8], strides = [1, 1]} : vector<8x96xf32> to vector<8x8xf32>
    %48 = vector.extract_strided_slice %43 {offsets = [0, 8], sizes = [8, 8], strides = [1, 1]} : vector<8x96xf32> to vector<8x8xf32>
    %49 = vector.extract_strided_slice %43 {offsets = [0, 16], sizes = [8, 8], strides = [1, 1]} : vector<8x96xf32> to vector<8x8xf32>
    %cst_29 = arith.constant dense<0.000000e+00> : vector<8x8xf32>
    %50 = tpu.matmul %47, %48, %cst_29 {dimension_numbers = #tpu.dot_dimension_numbers<[1], [1], [0], [0], [0, 0, 1, 0], [], []>} : vector<8x8xf32>, vector<8x8xf32>, vector<8x8xf32> -> vector<8x8xf32>
    %cst_30 = arith.constant 0.353553385 : f32
    %51 = vector.broadcast %cst_30 : f32 to vector<8x8xf32>
    %52 = arith.mulf %50, %51 : vector<8x8xf32>
    %cst_31 = arith.constant -3.40282347E+38 : f32
    %53 = vector.broadcast %cst_31 : f32 to vector<8x8xf32>
    %54 = arith.select %2, %52, %53 : vector<8x8xi1>, vector<8x8xf32>
    %cst_32 = arith.constant dense<0xFF800000> : vector<8xf32>
    %55 = vector.multi_reduction <maximumf>, %54, %cst_32 [1] : vector<8x8xf32> to vector<8xf32>
    %56 = vector.shape_cast %55 : vector<8xf32> to vector<8x1xf32>
    %57 = vector.broadcast %56 : vector<8x1xf32> to vector<8x8xf32>
    %58 = arith.subf %54, %57 : vector<8x8xf32>
    %59 = math.exp %58 : vector<8x8xf32>
    %cst_33 = arith.constant dense<0.000000e+00> : vector<8xf32>
    %60 = vector.multi_reduction <add>, %59, %cst_33 [1] : vector<8x8xf32> to vector<8xf32>
    %61 = vector.shape_cast %60 : vector<8xf32> to vector<8x1xf32>
    %cst_34 = arith.constant dense<0.000000e+00> : vector<8x8xf32>
    %62 = tpu.matmul %59, %49, %cst_34 {dimension_numbers = #tpu.dot_dimension_numbers<[1], [0], [0], [1], [0, 0, 1, 1], [], []>} : vector<8x8xf32>, vector<8x8xf32>, vector<8x8xf32> -> vector<8x8xf32>
    %63 = tpu.reciprocal %61 {approx = true} : vector<8x1xf32> -> vector<8x1xf32>
    %64 = vector.broadcast %63 : vector<8x1xf32> to vector<8x8xf32>
    %65 = arith.mulf %62, %64 : vector<8x8xf32>
    %66 = vector.extract_strided_slice %45 {offsets = [0, 0], sizes = [8, 32], strides = [1, 1]} : vector<32x32xf32> to vector<8x32xf32>
    %cst_35 = arith.constant dense<0.000000e+00> : vector<8x32xf32>
    %67 = tpu.matmul %65, %66, %cst_35 {dimension_numbers = #tpu.dot_dimension_numbers<[1], [0], [0], [1], [0, 0, 1, 1], [], []>} : vector<8x8xf32>, vector<8x32xf32>, vector<8x32xf32> -> vector<8x32xf32>
    %68 = arith.addf %46, %67 : vector<8x32xf32>
    %69 = vector.extract_strided_slice %43 {offsets = [0, 24], sizes = [8, 8], strides = [1, 1]} : vector<8x96xf32> to vector<8x8xf32>
    %70 = vector.extract_strided_slice %43 {offsets = [0, 32], sizes = [8, 8], strides = [1, 1]} : vector<8x96xf32> to vector<8x8xf32>
    %71 = vector.extract_strided_slice %43 {offsets = [0, 40], sizes = [8, 8], strides = [1, 1]} : vector<8x96xf32> to vector<8x8xf32>
    %cst_36 = arith.constant dense<0.000000e+00> : vector<8x8xf32>
    %72 = tpu.matmul %69, %70, %cst_36 {dimension_numbers = #tpu.dot_dimension_numbers<[1], [1], [0], [0], [0, 0, 1, 0], [], []>} : vector<8x8xf32>, vector<8x8xf32>, vector<8x8xf32> -> vector<8x8xf32>
    %cst_37 = arith.constant 0.353553385 : f32
    %73 = vector.broadcast %cst_37 : f32 to vector<8x8xf32>
    %74 = arith.mulf %72, %73 : vector<8x8xf32>
    %cst_38 = arith.constant -3.40282347E+38 : f32
    %75 = vector.broadcast %cst_38 : f32 to vector<8x8xf32>
    %76 = arith.select %2, %74, %75 : vector<8x8xi1>, vector<8x8xf32>
    %cst_39 = arith.constant dense<0xFF800000> : vector<8xf32>
    %77 = vector.multi_reduction <maximumf>, %76, %cst_39 [1] : vector<8x8xf32> to vector<8xf32>
    %78 = vector.shape_cast %77 : vector<8xf32> to vector<8x1xf32>
    %79 = vector.broadcast %78 : vector<8x1xf32> to vector<8x8xf32>
    %80 = arith.subf %76, %79 : vector<8x8xf32>
    %81 = math.exp %80 : vector<8x8xf32>
    %cst_40 = arith.constant dense<0.000000e+00> : vector<8xf32>
    %82 = vector.multi_reduction <add>, %81, %cst_40 [1] : vector<8x8xf32> to vector<8xf32>
    %83 = vector.shape_cast %82 : vector<8xf32> to vector<8x1xf32>
    %cst_41 = arith.constant dense<0.000000e+00> : vector<8x8xf32>
    %84 = tpu.matmul %81, %71, %cst_41 {dimension_numbers = #tpu.dot_dimension_numbers<[1], [0], [0], [1], [0, 0, 1, 1], [], []>} : vector<8x8xf32>, vector<8x8xf32>, vector<8x8xf32> -> vector<8x8xf32>
    %85 = tpu.reciprocal %83 {approx = true} : vector<8x1xf32> -> vector<8x1xf32>
    %86 = vector.broadcast %85 : vector<8x1xf32> to vector<8x8xf32>
    %87 = arith.mulf %84, %86 : vector<8x8xf32>
    %88 = vector.extract_strided_slice %45 {offsets = [8, 0], sizes = [8, 32], strides = [1, 1]} : vector<32x32xf32> to vector<8x32xf32>
    %cst_42 = arith.constant dense<0.000000e+00> : vector<8x32xf32>
    %89 = tpu.matmul %87, %88, %cst_42 {dimension_numbers = #tpu.dot_dimension_numbers<[1], [0], [0], [1], [0, 0, 1, 1], [], []>} : vector<8x8xf32>, vector<8x32xf32>, vector<8x32xf32> -> vector<8x32xf32>
    %90 = arith.addf %68, %89 : vector<8x32xf32>
    %91 = vector.extract_strided_slice %43 {offsets = [0, 48], sizes = [8, 8], strides = [1, 1]} : vector<8x96xf32> to vector<8x8xf32>
    %92 = vector.extract_strided_slice %43 {offsets = [0, 56], sizes = [8, 8], strides = [1, 1]} : vector<8x96xf32> to vector<8x8xf32>
    %93 = vector.extract_strided_slice %43 {offsets = [0, 64], sizes = [8, 8], strides = [1, 1]} : vector<8x96xf32> to vector<8x8xf32>
    %cst_43 = arith.constant dense<0.000000e+00> : vector<8x8xf32>
    %94 = tpu.matmul %91, %92, %cst_43 {dimension_numbers = #tpu.dot_dimension_numbers<[1], [1], [0], [0], [0, 0, 1, 0], [], []>} : vector<8x8xf32>, vector<8x8xf32>, vector<8x8xf32> -> vector<8x8xf32>
    %cst_44 = arith.constant 0.353553385 : f32
    %95 = vector.broadcast %cst_44 : f32 to vector<8x8xf32>
    %96 = arith.mulf %94, %95 : vector<8x8xf32>
    %cst_45 = arith.constant -3.40282347E+38 : f32
    %97 = vector.broadcast %cst_45 : f32 to vector<8x8xf32>
    %98 = arith.select %2, %96, %97 : vector<8x8xi1>, vector<8x8xf32>
    %cst_46 = arith.constant dense<0xFF800000> : vector<8xf32>
    %99 = vector.multi_reduction <maximumf>, %98, %cst_46 [1] : vector<8x8xf32> to vector<8xf32>
    %100 = vector.shape_cast %99 : vector<8xf32> to vector<8x1xf32>
    %101 = vector.broadcast %100 : vector<8x1xf32> to vector<8x8xf32>
    %102 = arith.subf %98, %101 : vector<8x8xf32>
    %103 = math.exp %102 : vector<8x8xf32>
    %cst_47 = arith.constant dense<0.000000e+00> : vector<8xf32>
    %104 = vector.multi_reduction <add>, %103, %cst_47 [1] : vector<8x8xf32> to vector<8xf32>
    %105 = vector.shape_cast %104 : vector<8xf32> to vector<8x1xf32>
    %cst_48 = arith.constant dense<0.000000e+00> : vector<8x8xf32>
    %106 = tpu.matmul %103, %93, %cst_48 {dimension_numbers = #tpu.dot_dimension_numbers<[1], [0], [0], [1], [0, 0, 1, 1], [], []>} : vector<8x8xf32>, vector<8x8xf32>, vector<8x8xf32> -> vector<8x8xf32>
    %107 = tpu.reciprocal %105 {approx = true} : vector<8x1xf32> -> vector<8x1xf32>
    %108 = vector.broadcast %107 : vector<8x1xf32> to vector<8x8xf32>
    %109 = arith.mulf %106, %108 : vector<8x8xf32>
    %110 = vector.extract_strided_slice %45 {offsets = [16, 0], sizes = [8, 32], strides = [1, 1]} : vector<32x32xf32> to vector<8x32xf32>
    %cst_49 = arith.constant dense<0.000000e+00> : vector<8x32xf32>
    %111 = tpu.matmul %109, %110, %cst_49 {dimension_numbers = #tpu.dot_dimension_numbers<[1], [0], [0], [1], [0, 0, 1, 1], [], []>} : vector<8x8xf32>, vector<8x32xf32>, vector<8x32xf32> -> vector<8x32xf32>
    %112 = arith.addf %90, %111 : vector<8x32xf32>
    %113 = vector.extract_strided_slice %43 {offsets = [0, 72], sizes = [8, 8], strides = [1, 1]} : vector<8x96xf32> to vector<8x8xf32>
    %114 = vector.extract_strided_slice %43 {offsets = [0, 80], sizes = [8, 8], strides = [1, 1]} : vector<8x96xf32> to vector<8x8xf32>
    %115 = vector.extract_strided_slice %43 {offsets = [0, 88], sizes = [8, 8], strides = [1, 1]} : vector<8x96xf32> to vector<8x8xf32>
    %cst_50 = arith.constant dense<0.000000e+00> : vector<8x8xf32>
    %116 = tpu.matmul %113, %114, %cst_50 {dimension_numbers = #tpu.dot_dimension_numbers<[1], [1], [0], [0], [0, 0, 1, 0], [], []>} : vector<8x8xf32>, vector<8x8xf32>, vector<8x8xf32> -> vector<8x8xf32>
    %cst_51 = arith.constant 0.353553385 : f32
    %117 = vector.broadcast %cst_51 : f32 to vector<8x8xf32>
    %118 = arith.mulf %116, %117 : vector<8x8xf32>
    %cst_52 = arith.constant -3.40282347E+38 : f32
    %119 = vector.broadcast %cst_52 : f32 to vector<8x8xf32>
    %120 = arith.select %2, %118, %119 : vector<8x8xi1>, vector<8x8xf32>
    %cst_53 = arith.constant dense<0xFF800000> : vector<8xf32>
    %121 = vector.multi_reduction <maximumf>, %120, %cst_53 [1] : vector<8x8xf32> to vector<8xf32>
    %122 = vector.shape_cast %121 : vector<8xf32> to vector<8x1xf32>
    %123 = vector.broadcast %122 : vector<8x1xf32> to vector<8x8xf32>
    %124 = arith.subf %120, %123 : vector<8x8xf32>
    %125 = math.exp %124 : vector<8x8xf32>
    %cst_54 = arith.constant dense<0.000000e+00> : vector<8xf32>
    %126 = vector.multi_reduction <add>, %125, %cst_54 [1] : vector<8x8xf32> to vector<8xf32>
    %127 = vector.shape_cast %126 : vector<8xf32> to vector<8x1xf32>
    %cst_55 = arith.constant dense<0.000000e+00> : vector<8x8xf32>
    %128 = tpu.matmul %125, %115, %cst_55 {dimension_numbers = #tpu.dot_dimension_numbers<[1], [0], [0], [1], [0, 0, 1, 1], [], []>} : vector<8x8xf32>, vector<8x8xf32>, vector<8x8xf32> -> vector<8x8xf32>
    %129 = tpu.reciprocal %127 {approx = true} : vector<8x1xf32> -> vector<8x1xf32>
    %130 = vector.broadcast %129 : vector<8x1xf32> to vector<8x8xf32>
    %131 = arith.mulf %128, %130 : vector<8x8xf32>
    %132 = vector.extract_strided_slice %45 {offsets = [24, 0], sizes = [8, 32], strides = [1, 1]} : vector<32x32xf32> to vector<8x32xf32>
    %cst_56 = arith.constant dense<0.000000e+00> : vector<8x32xf32>
    %133 = tpu.matmul %131, %132, %cst_56 {dimension_numbers = #tpu.dot_dimension_numbers<[1], [0], [0], [1], [0, 0, 1, 1], [], []>} : vector<8x8xf32>, vector<8x32xf32>, vector<8x32xf32> -> vector<8x32xf32>
    %134 = arith.addf %112, %133 : vector<8x32xf32>
    %c0_57 = arith.constant 0 : index
    %c0_58 = arith.constant 0 : index
    %c0_59 = arith.constant 0 : index
    %135 = vector.load %arg12[%c0_57, %c0_58, %c0_59] : memref<2x1x32xf32, #tpu.memory_space<vmem>>, vector<1x1x32xf32>
    %136 = vector.shape_cast %135 : vector<1x1x32xf32> to vector<1x32xf32>
    %137 = vector.broadcast %136 : vector<1x32xf32> to vector<8x32xf32>
    %138 = arith.addf %134, %137 : vector<8x32xf32>
    %c0_60 = arith.constant 0 : index
    %c0_61 = arith.constant 0 : index
    %c0_62 = arith.constant 0 : index
    %139 = vector.load %arg7[%c0_60, %c0_61, %c0_62] : memref<2x1x32xf32, #tpu.memory_space<vmem>>, vector<1x1x32xf32>
    %140 = vector.shape_cast %139 : vector<1x1x32xf32> to vector<1x32xf32>
    %c0_63 = arith.constant 0 : index
    %c0_64 = arith.constant 0 : index
    %c0_65 = arith.constant 0 : index
    %141 = vector.load %arg8[%c0_63, %c0_64, %c0_65] : memref<2x1x32xf32, #tpu.memory_space<vmem>>, vector<1x1x32xf32>
    %142 = vector.shape_cast %141 : vector<1x1x32xf32> to vector<1x32xf32>
    %cst_66 = arith.constant dense<0.000000e+00> : vector<8xf32>
    %143 = vector.multi_reduction <add>, %6, %cst_66 [1] : vector<8x32xf32> to vector<8xf32>
    %144 = vector.shape_cast %143 : vector<8xf32> to vector<8x1xf32>
    %cst_67 = arith.constant 3.200000e+01 : f32
    %145 = vector.broadcast %cst_67 : f32 to vector<8x1xf32>
    %146 = arith.divf %144, %145 : vector<8x1xf32>
    %147 = vector.broadcast %146 : vector<8x1xf32> to vector<8x32xf32>
    %148 = arith.subf %6, %147 : vector<8x32xf32>
    %149 = arith.mulf %148, %148 : vector<8x32xf32>
    %cst_68 = arith.constant dense<0.000000e+00> : vector<8xf32>
    %150 = vector.multi_reduction <add>, %149, %cst_68 [1] : vector<8x32xf32> to vector<8xf32>
    %151 = vector.shape_cast %150 : vector<8xf32> to vector<8x1xf32>
    %cst_69 = arith.constant 3.200000e+01 : f32
    %152 = vector.broadcast %cst_69 : f32 to vector<8x1xf32>
    %153 = arith.divf %151, %152 : vector<8x1xf32>
    %154 = vector.broadcast %146 : vector<8x1xf32> to vector<8x32xf32>
    %155 = arith.subf %6, %154 : vector<8x32xf32>
    %cst_70 = arith.constant 9.99999974E-6 : f32
    %156 = vector.broadcast %cst_70 : f32 to vector<8x1xf32>
    %157 = arith.addf %153, %156 : vector<8x1xf32>
    %158 = math.rsqrt %157 : vector<8x1xf32>
    %159 = vector.broadcast %158 : vector<8x1xf32> to vector<8x32xf32>
    %160 = arith.mulf %155, %159 : vector<8x32xf32>
    %161 = vector.broadcast %140 : vector<1x32xf32> to vector<8x32xf32>
    %162 = arith.mulf %160, %161 : vector<8x32xf32>
    %163 = vector.broadcast %142 : vector<1x32xf32> to vector<8x32xf32>
    %164 = arith.addf %162, %163 : vector<8x32xf32>
    %c0_71 = arith.constant 0 : index
    %c0_72 = arith.constant 0 : index
    %c0_73 = arith.constant 0 : index
    %165 = vector.load %arg13[%c0_71, %c0_72, %c0_73] : memref<2x32x128xf32, #tpu.memory_space<vmem>>, vector<1x32x128xf32>
    %166 = vector.shape_cast %165 : vector<1x32x128xf32> to vector<32x128xf32>
    %cst_74 = arith.constant dense<0.000000e+00> : vector<8x128xf32>
    %167 = tpu.matmul %164, %166, %cst_74 {dimension_numbers = #tpu.dot_dimension_numbers<[1], [0], [0], [1], [0, 0, 1, 1], [], []>} : vector<8x32xf32>, vector<32x128xf32>, vector<8x128xf32> -> vector<8x128xf32>
    %c0_75 = arith.constant 0 : index
    %c0_76 = arith.constant 0 : index
    %c0_77 = arith.constant 0 : index
    %168 = vector.load %arg14[%c0_75, %c0_76, %c0_77] : memref<2x1x128xf32, #tpu.memory_space<vmem>>, vector<1x1x128xf32>
    %169 = vector.shape_cast %168 : vector<1x1x128xf32> to vector<1x128xf32>
    %170 = vector.broadcast %169 : vector<1x128xf32> to vector<8x128xf32>
    %171 = arith.addf %167, %170 : vector<8x128xf32>
    %cst_78 = arith.constant 5.000000e-01 : f32
    %172 = vector.broadcast %cst_78 : f32 to vector<8x128xf32>
    %173 = arith.mulf %172, %171 : vector<8x128xf32>
    %cst_79 = arith.constant 0.707106769 : f32
    %174 = vector.broadcast %cst_79 : f32 to vector<8x128xf32>
    %175 = arith.mulf %171, %174 : vector<8x128xf32>
    %176 = math.absf %175 : vector<8x128xf32>
    %cst_80 = arith.constant 0.327591091 : f32
    %177 = vector.broadcast %cst_80 : f32 to vector<8x128xf32>
    %178 = arith.mulf %177, %176 : vector<8x128xf32>
    %cst_81 = arith.constant 1.000000e+00 : f32
    %179 = vector.broadcast %cst_81 : f32 to vector<8x128xf32>
    %180 = arith.addf %179, %178 : vector<8x128xf32>
    %cst_82 = arith.constant 1.000000e+00 : f32
    %181 = vector.broadcast %cst_82 : f32 to vector<8x128xf32>
    %182 = arith.divf %181, %180 : vector<8x128xf32>
    %cst_83 = arith.constant 1.06140542 : f32
    %183 = vector.broadcast %cst_83 : f32 to vector<8x128xf32>
    %184 = arith.mulf %183, %182 : vector<8x128xf32>
    %cst_84 = arith.constant 1.45315206 : f32
    %185 = vector.broadcast %cst_84 : f32 to vector<8x128xf32>
    %186 = arith.subf %184, %185 : vector<8x128xf32>
    %187 = arith.mulf %186, %182 : vector<8x128xf32>
    %cst_85 = arith.constant 1.42141378 : f32
    %188 = vector.broadcast %cst_85 : f32 to vector<8x128xf32>
    %189 = arith.addf %187, %188 : vector<8x128xf32>
    %190 = arith.mulf %189, %182 : vector<8x128xf32>
    %cst_86 = arith.constant 0.284496725 : f32
    %191 = vector.broadcast %cst_86 : f32 to vector<8x128xf32>
    %192 = arith.subf %190, %191 : vector<8x128xf32>
    %193 = arith.mulf %192, %182 : vector<8x128xf32>
    %cst_87 = arith.constant 0.254829586 : f32
    %194 = vector.broadcast %cst_87 : f32 to vector<8x128xf32>
    %195 = arith.addf %193, %194 : vector<8x128xf32>
    %196 = arith.mulf %195, %182 : vector<8x128xf32>
    %cst_88 = arith.constant 0.000000e+00 : f32
    %197 = vector.broadcast %cst_88 : f32 to vector<8x128xf32>
    %198 = arith.subf %197, %176 : vector<8x128xf32>
    %199 = arith.mulf %198, %176 : vector<8x128xf32>
    %200 = math.exp %199 : vector<8x128xf32>
    %201 = arith.mulf %196, %200 : vector<8x128xf32>
    %cst_89 = arith.constant 1.000000e+00 : f32
    %202 = vector.broadcast %cst_89 : f32 to vector<8x128xf32>
    %203 = arith.subf %202, %201 : vector<8x128xf32>
    %cst_90 = arith.constant 0.000000e+00 : f32
    %204 = vector.broadcast %cst_90 : f32 to vector<8x128xf32>
    %205 = arith.cmpf olt, %175, %204 : vector<8x128xf32>
    %cst_91 = arith.constant 0.000000e+00 : f32
    %206 = vector.broadcast %cst_91 : f32 to vector<8x128xf32>
    %207 = arith.subf %206, %203 : vector<8x128xf32>
    %208 = arith.select %205, %207, %203 : vector<8x128xi1>, vector<8x128xf32>
    %cst_92 = arith.constant 1.000000e+00 : f32
    %209 = vector.broadcast %cst_92 : f32 to vector<8x128xf32>
    %210 = arith.addf %209, %208 : vector<8x128xf32>
    %211 = arith.mulf %173, %210 : vector<8x128xf32>
    %c0_93 = arith.constant 0 : index
    %c0_94 = arith.constant 0 : index
    %c0_95 = arith.constant 0 : index
    %212 = vector.load %arg15[%c0_93, %c0_94, %c0_95] : memref<2x128x32xf32, #tpu.memory_space<vmem>>, vector<1x128x32xf32>
    %213 = vector.shape_cast %212 : vector<1x128x32xf32> to vector<128x32xf32>
    %cst_96 = arith.constant dense<0.000000e+00> : vector<8x32xf32>
    %214 = tpu.matmul %211, %213, %cst_96 {dimension_numbers = #tpu.dot_dimension_numbers<[1], [0], [0], [1], [0, 0, 1, 1], [], []>} : vector<8x128xf32>, vector<128x32xf32>, vector<8x32xf32> -> vector<8x32xf32>
    %c0_97 = arith.constant 0 : index
    %c0_98 = arith.constant 0 : index
    %c0_99 = arith.constant 0 : index
    %215 = vector.load %arg16[%c0_97, %c0_98, %c0_99] : memref<2x1x32xf32, #tpu.memory_space<vmem>>, vector<1x1x32xf32>
    %216 = vector.shape_cast %215 : vector<1x1x32xf32> to vector<1x32xf32>
    %217 = vector.broadcast %216 : vector<1x32xf32> to vector<8x32xf32>
    %218 = arith.addf %214, %217 : vector<8x32xf32>
    %219 = arith.addf %6, %138 : vector<8x32xf32>
    %220 = arith.addf %219, %218 : vector<8x32xf32>
    %c1 = arith.constant 1 : index
    %c0_100 = arith.constant 0 : index
    %c0_101 = arith.constant 0 : index
    %221 = vector.load %arg5[%c1, %c0_100, %c0_101] : memref<2x1x32xf32, #tpu.memory_space<vmem>>, vector<1x1x32xf32>
    %222 = vector.shape_cast %221 : vector<1x1x32xf32> to vector<1x32xf32>
    %c1_102 = arith.constant 1 : index
    %c0_103 = arith.constant 0 : index
    %c0_104 = arith.constant 0 : index
    %223 = vector.load %arg6[%c1_102, %c0_103, %c0_104] : memref<2x1x32xf32, #tpu.memory_space<vmem>>, vector<1x1x32xf32>
    %224 = vector.shape_cast %223 : vector<1x1x32xf32> to vector<1x32xf32>
    %cst_105 = arith.constant dense<0.000000e+00> : vector<8xf32>
    %225 = vector.multi_reduction <add>, %220, %cst_105 [1] : vector<8x32xf32> to vector<8xf32>
    %226 = vector.shape_cast %225 : vector<8xf32> to vector<8x1xf32>
    %cst_106 = arith.constant 3.200000e+01 : f32
    %227 = vector.broadcast %cst_106 : f32 to vector<8x1xf32>
    %228 = arith.divf %226, %227 : vector<8x1xf32>
    %229 = vector.broadcast %228 : vector<8x1xf32> to vector<8x32xf32>
    %230 = arith.subf %220, %229 : vector<8x32xf32>
    %231 = arith.mulf %230, %230 : vector<8x32xf32>
    %cst_107 = arith.constant dense<0.000000e+00> : vector<8xf32>
    %232 = vector.multi_reduction <add>, %231, %cst_107 [1] : vector<8x32xf32> to vector<8xf32>
    %233 = vector.shape_cast %232 : vector<8xf32> to vector<8x1xf32>
    %cst_108 = arith.constant 3.200000e+01 : f32
    %234 = vector.broadcast %cst_108 : f32 to vector<8x1xf32>
    %235 = arith.divf %233, %234 : vector<8x1xf32>
    %236 = vector.broadcast %228 : vector<8x1xf32> to vector<8x32xf32>
    %237 = arith.subf %220, %236 : vector<8x32xf32>
    %cst_109 = arith.constant 9.99999974E-6 : f32
    %238 = vector.broadcast %cst_109 : f32 to vector<8x1xf32>
    %239 = arith.addf %235, %238 : vector<8x1xf32>
    %240 = math.rsqrt %239 : vector<8x1xf32>
    %241 = vector.broadcast %240 : vector<8x1xf32> to vector<8x32xf32>
    %242 = arith.mulf %237, %241 : vector<8x32xf32>
    %243 = vector.broadcast %222 : vector<1x32xf32> to vector<8x32xf32>
    %244 = arith.mulf %242, %243 : vector<8x32xf32>
    %245 = vector.broadcast %224 : vector<1x32xf32> to vector<8x32xf32>
    %246 = arith.addf %244, %245 : vector<8x32xf32>
    %c1_110 = arith.constant 1 : index
    %c0_111 = arith.constant 0 : index
    %c0_112 = arith.constant 0 : index
    %247 = vector.load %arg9[%c1_110, %c0_111, %c0_112] : memref<2x32x96xf32, #tpu.memory_space<vmem>>, vector<1x32x96xf32>
    %248 = vector.shape_cast %247 : vector<1x32x96xf32> to vector<32x96xf32>
    %cst_113 = arith.constant dense<0.000000e+00> : vector<8x96xf32>
    %249 = tpu.matmul %246, %248, %cst_113 {dimension_numbers = #tpu.dot_dimension_numbers<[1], [0], [0], [1], [0, 0, 1, 1], [], []>} : vector<8x32xf32>, vector<32x96xf32>, vector<8x96xf32> -> vector<8x96xf32>
    %c1_114 = arith.constant 1 : index
    %c0_115 = arith.constant 0 : index
    %c0_116 = arith.constant 0 : index
    %250 = vector.load %arg10[%c1_114, %c0_115, %c0_116] : memref<2x1x96xf32, #tpu.memory_space<vmem>>, vector<1x1x96xf32>
    %251 = vector.shape_cast %250 : vector<1x1x96xf32> to vector<1x96xf32>
    %252 = vector.broadcast %251 : vector<1x96xf32> to vector<8x96xf32>
    %253 = arith.addf %249, %252 : vector<8x96xf32>
    %254 = arith.mulf %253, %3 : vector<8x96xf32>
    %cst_117 = arith.constant dense<0.000000e+00> : vector<8x96xf32>
    %255 = tpu.matmul %253, %5, %cst_117 {dimension_numbers = #tpu.dot_dimension_numbers<[1], [0], [0], [1], [0, 0, 1, 1], [], []>} : vector<8x96xf32>, vector<96x96xf32>, vector<8x96xf32> -> vector<8x96xf32>
    %256 = arith.mulf %255, %4 : vector<8x96xf32>
    %257 = arith.addf %254, %256 : vector<8x96xf32>
    %c1_118 = arith.constant 1 : index
    %c0_119 = arith.constant 0 : index
    %c0_120 = arith.constant 0 : index
    %258 = vector.load %arg11[%c1_118, %c0_119, %c0_120] : memref<2x32x32xf32, #tpu.memory_space<vmem>>, vector<1x32x32xf32>
    %259 = vector.shape_cast %258 : vector<1x32x32xf32> to vector<32x32xf32>
    %cst_121 = arith.constant 0.000000e+00 : f32
    %260 = vector.broadcast %cst_121 : f32 to vector<8x32xf32>
    %261 = vector.extract_strided_slice %257 {offsets = [0, 0], sizes = [8, 8], strides = [1, 1]} : vector<8x96xf32> to vector<8x8xf32>
    %262 = vector.extract_strided_slice %257 {offsets = [0, 8], sizes = [8, 8], strides = [1, 1]} : vector<8x96xf32> to vector<8x8xf32>
    %263 = vector.extract_strided_slice %257 {offsets = [0, 16], sizes = [8, 8], strides = [1, 1]} : vector<8x96xf32> to vector<8x8xf32>
    %cst_122 = arith.constant dense<0.000000e+00> : vector<8x8xf32>
    %264 = tpu.matmul %261, %262, %cst_122 {dimension_numbers = #tpu.dot_dimension_numbers<[1], [1], [0], [0], [0, 0, 1, 0], [], []>} : vector<8x8xf32>, vector<8x8xf32>, vector<8x8xf32> -> vector<8x8xf32>
    %cst_123 = arith.constant 0.353553385 : f32
    %265 = vector.broadcast %cst_123 : f32 to vector<8x8xf32>
    %266 = arith.mulf %264, %265 : vector<8x8xf32>
    %cst_124 = arith.constant -3.40282347E+38 : f32
    %267 = vector.broadcast %cst_124 : f32 to vector<8x8xf32>
    %268 = arith.select %2, %266, %267 : vector<8x8xi1>, vector<8x8xf32>
    %cst_125 = arith.constant dense<0xFF800000> : vector<8xf32>
    %269 = vector.multi_reduction <maximumf>, %268, %cst_125 [1] : vector<8x8xf32> to vector<8xf32>
    %270 = vector.shape_cast %269 : vector<8xf32> to vector<8x1xf32>
    %271 = vector.broadcast %270 : vector<8x1xf32> to vector<8x8xf32>
    %272 = arith.subf %268, %271 : vector<8x8xf32>
    %273 = math.exp %272 : vector<8x8xf32>
    %cst_126 = arith.constant dense<0.000000e+00> : vector<8xf32>
    %274 = vector.multi_reduction <add>, %273, %cst_126 [1] : vector<8x8xf32> to vector<8xf32>
    %275 = vector.shape_cast %274 : vector<8xf32> to vector<8x1xf32>
    %cst_127 = arith.constant dense<0.000000e+00> : vector<8x8xf32>
    %276 = tpu.matmul %273, %263, %cst_127 {dimension_numbers = #tpu.dot_dimension_numbers<[1], [0], [0], [1], [0, 0, 1, 1], [], []>} : vector<8x8xf32>, vector<8x8xf32>, vector<8x8xf32> -> vector<8x8xf32>
    %277 = tpu.reciprocal %275 {approx = true} : vector<8x1xf32> -> vector<8x1xf32>
    %278 = vector.broadcast %277 : vector<8x1xf32> to vector<8x8xf32>
    %279 = arith.mulf %276, %278 : vector<8x8xf32>
    %280 = vector.extract_strided_slice %259 {offsets = [0, 0], sizes = [8, 32], strides = [1, 1]} : vector<32x32xf32> to vector<8x32xf32>
    %cst_128 = arith.constant dense<0.000000e+00> : vector<8x32xf32>
    %281 = tpu.matmul %279, %280, %cst_128 {dimension_numbers = #tpu.dot_dimension_numbers<[1], [0], [0], [1], [0, 0, 1, 1], [], []>} : vector<8x8xf32>, vector<8x32xf32>, vector<8x32xf32> -> vector<8x32xf32>
    %282 = arith.addf %260, %281 : vector<8x32xf32>
    %283 = vector.extract_strided_slice %257 {offsets = [0, 24], sizes = [8, 8], strides = [1, 1]} : vector<8x96xf32> to vector<8x8xf32>
    %284 = vector.extract_strided_slice %257 {offsets = [0, 32], sizes = [8, 8], strides = [1, 1]} : vector<8x96xf32> to vector<8x8xf32>
    %285 = vector.extract_strided_slice %257 {offsets = [0, 40], sizes = [8, 8], strides = [1, 1]} : vector<8x96xf32> to vector<8x8xf32>
    %cst_129 = arith.constant dense<0.000000e+00> : vector<8x8xf32>
    %286 = tpu.matmul %283, %284, %cst_129 {dimension_numbers = #tpu.dot_dimension_numbers<[1], [1], [0], [0], [0, 0, 1, 0], [], []>} : vector<8x8xf32>, vector<8x8xf32>, vector<8x8xf32> -> vector<8x8xf32>
    %cst_130 = arith.constant 0.353553385 : f32
    %287 = vector.broadcast %cst_130 : f32 to vector<8x8xf32>
    %288 = arith.mulf %286, %287 : vector<8x8xf32>
    %cst_131 = arith.constant -3.40282347E+38 : f32
    %289 = vector.broadcast %cst_131 : f32 to vector<8x8xf32>
    %290 = arith.select %2, %288, %289 : vector<8x8xi1>, vector<8x8xf32>
    %cst_132 = arith.constant dense<0xFF800000> : vector<8xf32>
    %291 = vector.multi_reduction <maximumf>, %290, %cst_132 [1] : vector<8x8xf32> to vector<8xf32>
    %292 = vector.shape_cast %291 : vector<8xf32> to vector<8x1xf32>
    %293 = vector.broadcast %292 : vector<8x1xf32> to vector<8x8xf32>
    %294 = arith.subf %290, %293 : vector<8x8xf32>
    %295 = math.exp %294 : vector<8x8xf32>
    %cst_133 = arith.constant dense<0.000000e+00> : vector<8xf32>
    %296 = vector.multi_reduction <add>, %295, %cst_133 [1] : vector<8x8xf32> to vector<8xf32>
    %297 = vector.shape_cast %296 : vector<8xf32> to vector<8x1xf32>
    %cst_134 = arith.constant dense<0.000000e+00> : vector<8x8xf32>
    %298 = tpu.matmul %295, %285, %cst_134 {dimension_numbers = #tpu.dot_dimension_numbers<[1], [0], [0], [1], [0, 0, 1, 1], [], []>} : vector<8x8xf32>, vector<8x8xf32>, vector<8x8xf32> -> vector<8x8xf32>
    %299 = tpu.reciprocal %297 {approx = true} : vector<8x1xf32> -> vector<8x1xf32>
    %300 = vector.broadcast %299 : vector<8x1xf32> to vector<8x8xf32>
    %301 = arith.mulf %298, %300 : vector<8x8xf32>
    %302 = vector.extract_strided_slice %259 {offsets = [8, 0], sizes = [8, 32], strides = [1, 1]} : vector<32x32xf32> to vector<8x32xf32>
    %cst_135 = arith.constant dense<0.000000e+00> : vector<8x32xf32>
    %303 = tpu.matmul %301, %302, %cst_135 {dimension_numbers = #tpu.dot_dimension_numbers<[1], [0], [0], [1], [0, 0, 1, 1], [], []>} : vector<8x8xf32>, vector<8x32xf32>, vector<8x32xf32> -> vector<8x32xf32>
    %304 = arith.addf %282, %303 : vector<8x32xf32>
    %305 = vector.extract_strided_slice %257 {offsets = [0, 48], sizes = [8, 8], strides = [1, 1]} : vector<8x96xf32> to vector<8x8xf32>
    %306 = vector.extract_strided_slice %257 {offsets = [0, 56], sizes = [8, 8], strides = [1, 1]} : vector<8x96xf32> to vector<8x8xf32>
    %307 = vector.extract_strided_slice %257 {offsets = [0, 64], sizes = [8, 8], strides = [1, 1]} : vector<8x96xf32> to vector<8x8xf32>
    %cst_136 = arith.constant dense<0.000000e+00> : vector<8x8xf32>
    %308 = tpu.matmul %305, %306, %cst_136 {dimension_numbers = #tpu.dot_dimension_numbers<[1], [1], [0], [0], [0, 0, 1, 0], [], []>} : vector<8x8xf32>, vector<8x8xf32>, vector<8x8xf32> -> vector<8x8xf32>
    %cst_137 = arith.constant 0.353553385 : f32
    %309 = vector.broadcast %cst_137 : f32 to vector<8x8xf32>
    %310 = arith.mulf %308, %309 : vector<8x8xf32>
    %cst_138 = arith.constant -3.40282347E+38 : f32
    %311 = vector.broadcast %cst_138 : f32 to vector<8x8xf32>
    %312 = arith.select %2, %310, %311 : vector<8x8xi1>, vector<8x8xf32>
    %cst_139 = arith.constant dense<0xFF800000> : vector<8xf32>
    %313 = vector.multi_reduction <maximumf>, %312, %cst_139 [1] : vector<8x8xf32> to vector<8xf32>
    %314 = vector.shape_cast %313 : vector<8xf32> to vector<8x1xf32>
    %315 = vector.broadcast %314 : vector<8x1xf32> to vector<8x8xf32>
    %316 = arith.subf %312, %315 : vector<8x8xf32>
    %317 = math.exp %316 : vector<8x8xf32>
    %cst_140 = arith.constant dense<0.000000e+00> : vector<8xf32>
    %318 = vector.multi_reduction <add>, %317, %cst_140 [1] : vector<8x8xf32> to vector<8xf32>
    %319 = vector.shape_cast %318 : vector<8xf32> to vector<8x1xf32>
    %cst_141 = arith.constant dense<0.000000e+00> : vector<8x8xf32>
    %320 = tpu.matmul %317, %307, %cst_141 {dimension_numbers = #tpu.dot_dimension_numbers<[1], [0], [0], [1], [0, 0, 1, 1], [], []>} : vector<8x8xf32>, vector<8x8xf32>, vector<8x8xf32> -> vector<8x8xf32>
    %321 = tpu.reciprocal %319 {approx = true} : vector<8x1xf32> -> vector<8x1xf32>
    %322 = vector.broadcast %321 : vector<8x1xf32> to vector<8x8xf32>
    %323 = arith.mulf %320, %322 : vector<8x8xf32>
    %324 = vector.extract_strided_slice %259 {offsets = [16, 0], sizes = [8, 32], strides = [1, 1]} : vector<32x32xf32> to vector<8x32xf32>
    %cst_142 = arith.constant dense<0.000000e+00> : vector<8x32xf32>
    %325 = tpu.matmul %323, %324, %cst_142 {dimension_numbers = #tpu.dot_dimension_numbers<[1], [0], [0], [1], [0, 0, 1, 1], [], []>} : vector<8x8xf32>, vector<8x32xf32>, vector<8x32xf32> -> vector<8x32xf32>
    %326 = arith.addf %304, %325 : vector<8x32xf32>
    %327 = vector.extract_strided_slice %257 {offsets = [0, 72], sizes = [8, 8], strides = [1, 1]} : vector<8x96xf32> to vector<8x8xf32>
    %328 = vector.extract_strided_slice %257 {offsets = [0, 80], sizes = [8, 8], strides = [1, 1]} : vector<8x96xf32> to vector<8x8xf32>
    %329 = vector.extract_strided_slice %257 {offsets = [0, 88], sizes = [8, 8], strides = [1, 1]} : vector<8x96xf32> to vector<8x8xf32>
    %cst_143 = arith.constant dense<0.000000e+00> : vector<8x8xf32>
    %330 = tpu.matmul %327, %328, %cst_143 {dimension_numbers = #tpu.dot_dimension_numbers<[1], [1], [0], [0], [0, 0, 1, 0], [], []>} : vector<8x8xf32>, vector<8x8xf32>, vector<8x8xf32> -> vector<8x8xf32>
    %cst_144 = arith.constant 0.353553385 : f32
    %331 = vector.broadcast %cst_144 : f32 to vector<8x8xf32>
    %332 = arith.mulf %330, %331 : vector<8x8xf32>
    %cst_145 = arith.constant -3.40282347E+38 : f32
    %333 = vector.broadcast %cst_145 : f32 to vector<8x8xf32>
    %334 = arith.select %2, %332, %333 : vector<8x8xi1>, vector<8x8xf32>
    %cst_146 = arith.constant dense<0xFF800000> : vector<8xf32>
    %335 = vector.multi_reduction <maximumf>, %334, %cst_146 [1] : vector<8x8xf32> to vector<8xf32>
    %336 = vector.shape_cast %335 : vector<8xf32> to vector<8x1xf32>
    %337 = vector.broadcast %336 : vector<8x1xf32> to vector<8x8xf32>
    %338 = arith.subf %334, %337 : vector<8x8xf32>
    %339 = math.exp %338 : vector<8x8xf32>
    %cst_147 = arith.constant dense<0.000000e+00> : vector<8xf32>
    %340 = vector.multi_reduction <add>, %339, %cst_147 [1] : vector<8x8xf32> to vector<8xf32>
    %341 = vector.shape_cast %340 : vector<8xf32> to vector<8x1xf32>
    %cst_148 = arith.constant dense<0.000000e+00> : vector<8x8xf32>
    %342 = tpu.matmul %339, %329, %cst_148 {dimension_numbers = #tpu.dot_dimension_numbers<[1], [0], [0], [1], [0, 0, 1, 1], [], []>} : vector<8x8xf32>, vector<8x8xf32>, vector<8x8xf32> -> vector<8x8xf32>
    %343 = tpu.reciprocal %341 {approx = true} : vector<8x1xf32> -> vector<8x1xf32>
    %344 = vector.broadcast %343 : vector<8x1xf32> to vector<8x8xf32>
    %345 = arith.mulf %342, %344 : vector<8x8xf32>
    %346 = vector.extract_strided_slice %259 {offsets = [24, 0], sizes = [8, 32], strides = [1, 1]} : vector<32x32xf32> to vector<8x32xf32>
    %cst_149 = arith.constant dense<0.000000e+00> : vector<8x32xf32>
    %347 = tpu.matmul %345, %346, %cst_149 {dimension_numbers = #tpu.dot_dimension_numbers<[1], [0], [0], [1], [0, 0, 1, 1], [], []>} : vector<8x8xf32>, vector<8x32xf32>, vector<8x32xf32> -> vector<8x32xf32>
    %348 = arith.addf %326, %347 : vector<8x32xf32>
    %c1_150 = arith.constant 1 : index
    %c0_151 = arith.constant 0 : index
    %c0_152 = arith.constant 0 : index
    %349 = vector.load %arg12[%c1_150, %c0_151, %c0_152] : memref<2x1x32xf32, #tpu.memory_space<vmem>>, vector<1x1x32xf32>
    %350 = vector.shape_cast %349 : vector<1x1x32xf32> to vector<1x32xf32>
    %351 = vector.broadcast %350 : vector<1x32xf32> to vector<8x32xf32>
    %352 = arith.addf %348, %351 : vector<8x32xf32>
    %c1_153 = arith.constant 1 : index
    %c0_154 = arith.constant 0 : index
    %c0_155 = arith.constant 0 : index
    %353 = vector.load %arg7[%c1_153, %c0_154, %c0_155] : memref<2x1x32xf32, #tpu.memory_space<vmem>>, vector<1x1x32xf32>
    %354 = vector.shape_cast %353 : vector<1x1x32xf32> to vector<1x32xf32>
    %c1_156 = arith.constant 1 : index
    %c0_157 = arith.constant 0 : index
    %c0_158 = arith.constant 0 : index
    %355 = vector.load %arg8[%c1_156, %c0_157, %c0_158] : memref<2x1x32xf32, #tpu.memory_space<vmem>>, vector<1x1x32xf32>
    %356 = vector.shape_cast %355 : vector<1x1x32xf32> to vector<1x32xf32>
    %cst_159 = arith.constant dense<0.000000e+00> : vector<8xf32>
    %357 = vector.multi_reduction <add>, %220, %cst_159 [1] : vector<8x32xf32> to vector<8xf32>
    %358 = vector.shape_cast %357 : vector<8xf32> to vector<8x1xf32>
    %cst_160 = arith.constant 3.200000e+01 : f32
    %359 = vector.broadcast %cst_160 : f32 to vector<8x1xf32>
    %360 = arith.divf %358, %359 : vector<8x1xf32>
    %361 = vector.broadcast %360 : vector<8x1xf32> to vector<8x32xf32>
    %362 = arith.subf %220, %361 : vector<8x32xf32>
    %363 = arith.mulf %362, %362 : vector<8x32xf32>
    %cst_161 = arith.constant dense<0.000000e+00> : vector<8xf32>
    %364 = vector.multi_reduction <add>, %363, %cst_161 [1] : vector<8x32xf32> to vector<8xf32>
    %365 = vector.shape_cast %364 : vector<8xf32> to vector<8x1xf32>
    %cst_162 = arith.constant 3.200000e+01 : f32
    %366 = vector.broadcast %cst_162 : f32 to vector<8x1xf32>
    %367 = arith.divf %365, %366 : vector<8x1xf32>
    %368 = vector.broadcast %360 : vector<8x1xf32> to vector<8x32xf32>
    %369 = arith.subf %220, %368 : vector<8x32xf32>
    %cst_163 = arith.constant 9.99999974E-6 : f32
    %370 = vector.broadcast %cst_163 : f32 to vector<8x1xf32>
    %371 = arith.addf %367, %370 : vector<8x1xf32>
    %372 = math.rsqrt %371 : vector<8x1xf32>
    %373 = vector.broadcast %372 : vector<8x1xf32> to vector<8x32xf32>
    %374 = arith.mulf %369, %373 : vector<8x32xf32>
    %375 = vector.broadcast %354 : vector<1x32xf32> to vector<8x32xf32>
    %376 = arith.mulf %374, %375 : vector<8x32xf32>
    %377 = vector.broadcast %356 : vector<1x32xf32> to vector<8x32xf32>
    %378 = arith.addf %376, %377 : vector<8x32xf32>
    %c1_164 = arith.constant 1 : index
    %c0_165 = arith.constant 0 : index
    %c0_166 = arith.constant 0 : index
    %379 = vector.load %arg13[%c1_164, %c0_165, %c0_166] : memref<2x32x128xf32, #tpu.memory_space<vmem>>, vector<1x32x128xf32>
    %380 = vector.shape_cast %379 : vector<1x32x128xf32> to vector<32x128xf32>
    %cst_167 = arith.constant dense<0.000000e+00> : vector<8x128xf32>
    %381 = tpu.matmul %378, %380, %cst_167 {dimension_numbers = #tpu.dot_dimension_numbers<[1], [0], [0], [1], [0, 0, 1, 1], [], []>} : vector<8x32xf32>, vector<32x128xf32>, vector<8x128xf32> -> vector<8x128xf32>
    %c1_168 = arith.constant 1 : index
    %c0_169 = arith.constant 0 : index
    %c0_170 = arith.constant 0 : index
    %382 = vector.load %arg14[%c1_168, %c0_169, %c0_170] : memref<2x1x128xf32, #tpu.memory_space<vmem>>, vector<1x1x128xf32>
    %383 = vector.shape_cast %382 : vector<1x1x128xf32> to vector<1x128xf32>
    %384 = vector.broadcast %383 : vector<1x128xf32> to vector<8x128xf32>
    %385 = arith.addf %381, %384 : vector<8x128xf32>
    %cst_171 = arith.constant 5.000000e-01 : f32
    %386 = vector.broadcast %cst_171 : f32 to vector<8x128xf32>
    %387 = arith.mulf %386, %385 : vector<8x128xf32>
    %cst_172 = arith.constant 0.707106769 : f32
    %388 = vector.broadcast %cst_172 : f32 to vector<8x128xf32>
    %389 = arith.mulf %385, %388 : vector<8x128xf32>
    %390 = math.absf %389 : vector<8x128xf32>
    %cst_173 = arith.constant 0.327591091 : f32
    %391 = vector.broadcast %cst_173 : f32 to vector<8x128xf32>
    %392 = arith.mulf %391, %390 : vector<8x128xf32>
    %cst_174 = arith.constant 1.000000e+00 : f32
    %393 = vector.broadcast %cst_174 : f32 to vector<8x128xf32>
    %394 = arith.addf %393, %392 : vector<8x128xf32>
    %cst_175 = arith.constant 1.000000e+00 : f32
    %395 = vector.broadcast %cst_175 : f32 to vector<8x128xf32>
    %396 = arith.divf %395, %394 : vector<8x128xf32>
    %cst_176 = arith.constant 1.06140542 : f32
    %397 = vector.broadcast %cst_176 : f32 to vector<8x128xf32>
    %398 = arith.mulf %397, %396 : vector<8x128xf32>
    %cst_177 = arith.constant 1.45315206 : f32
    %399 = vector.broadcast %cst_177 : f32 to vector<8x128xf32>
    %400 = arith.subf %398, %399 : vector<8x128xf32>
    %401 = arith.mulf %400, %396 : vector<8x128xf32>
    %cst_178 = arith.constant 1.42141378 : f32
    %402 = vector.broadcast %cst_178 : f32 to vector<8x128xf32>
    %403 = arith.addf %401, %402 : vector<8x128xf32>
    %404 = arith.mulf %403, %396 : vector<8x128xf32>
    %cst_179 = arith.constant 0.284496725 : f32
    %405 = vector.broadcast %cst_179 : f32 to vector<8x128xf32>
    %406 = arith.subf %404, %405 : vector<8x128xf32>
    %407 = arith.mulf %406, %396 : vector<8x128xf32>
    %cst_180 = arith.constant 0.254829586 : f32
    %408 = vector.broadcast %cst_180 : f32 to vector<8x128xf32>
    %409 = arith.addf %407, %408 : vector<8x128xf32>
    %410 = arith.mulf %409, %396 : vector<8x128xf32>
    %cst_181 = arith.constant 0.000000e+00 : f32
    %411 = vector.broadcast %cst_181 : f32 to vector<8x128xf32>
    %412 = arith.subf %411, %390 : vector<8x128xf32>
    %413 = arith.mulf %412, %390 : vector<8x128xf32>
    %414 = math.exp %413 : vector<8x128xf32>
    %415 = arith.mulf %410, %414 : vector<8x128xf32>
    %cst_182 = arith.constant 1.000000e+00 : f32
    %416 = vector.broadcast %cst_182 : f32 to vector<8x128xf32>
    %417 = arith.subf %416, %415 : vector<8x128xf32>
    %cst_183 = arith.constant 0.000000e+00 : f32
    %418 = vector.broadcast %cst_183 : f32 to vector<8x128xf32>
    %419 = arith.cmpf olt, %389, %418 : vector<8x128xf32>
    %cst_184 = arith.constant 0.000000e+00 : f32
    %420 = vector.broadcast %cst_184 : f32 to vector<8x128xf32>
    %421 = arith.subf %420, %417 : vector<8x128xf32>
    %422 = arith.select %419, %421, %417 : vector<8x128xi1>, vector<8x128xf32>
    %cst_185 = arith.constant 1.000000e+00 : f32
    %423 = vector.broadcast %cst_185 : f32 to vector<8x128xf32>
    %424 = arith.addf %423, %422 : vector<8x128xf32>
    %425 = arith.mulf %387, %424 : vector<8x128xf32>
    %c1_186 = arith.constant 1 : index
    %c0_187 = arith.constant 0 : index
    %c0_188 = arith.constant 0 : index
    %426 = vector.load %arg15[%c1_186, %c0_187, %c0_188] : memref<2x128x32xf32, #tpu.memory_space<vmem>>, vector<1x128x32xf32>
    %427 = vector.shape_cast %426 : vector<1x128x32xf32> to vector<128x32xf32>
    %cst_189 = arith.constant dense<0.000000e+00> : vector<8x32xf32>
    %428 = tpu.matmul %425, %427, %cst_189 {dimension_numbers = #tpu.dot_dimension_numbers<[1], [0], [0], [1], [0, 0, 1, 1], [], []>} : vector<8x128xf32>, vector<128x32xf32>, vector<8x32xf32> -> vector<8x32xf32>
    %c1_190 = arith.constant 1 : index
    %c0_191 = arith.constant 0 : index
    %c0_192 = arith.constant 0 : index
    %429 = vector.load %arg16[%c1_190, %c0_191, %c0_192] : memref<2x1x32xf32, #tpu.memory_space<vmem>>, vector<1x1x32xf32>
    %430 = vector.shape_cast %429 : vector<1x1x32xf32> to vector<1x32xf32>
    %431 = vector.broadcast %430 : vector<1x32xf32> to vector<8x32xf32>
    %432 = arith.addf %428, %431 : vector<8x32xf32>
    %433 = arith.addf %220, %352 : vector<8x32xf32>
    %434 = arith.addf %433, %432 : vector<8x32xf32>
    %c0_193 = arith.constant 0 : index
    %c0_194 = arith.constant 0 : index
    %435 = vector.load %arg17[%c0_193, %c0_194] : memref<1x32xf32, #tpu.memory_space<vmem>>, vector<1x32xf32>
    %c0_195 = arith.constant 0 : index
    %c0_196 = arith.constant 0 : index
    %436 = vector.load %arg18[%c0_195, %c0_196] : memref<1x32xf32, #tpu.memory_space<vmem>>, vector<1x32xf32>
    %cst_197 = arith.constant dense<0.000000e+00> : vector<8xf32>
    %437 = vector.multi_reduction <add>, %434, %cst_197 [1] : vector<8x32xf32> to vector<8xf32>
    %438 = vector.shape_cast %437 : vector<8xf32> to vector<8x1xf32>
    %cst_198 = arith.constant 3.200000e+01 : f32
    %439 = vector.broadcast %cst_198 : f32 to vector<8x1xf32>
    %440 = arith.divf %438, %439 : vector<8x1xf32>
    %441 = vector.broadcast %440 : vector<8x1xf32> to vector<8x32xf32>
    %442 = arith.subf %434, %441 : vector<8x32xf32>
    %443 = arith.mulf %442, %442 : vector<8x32xf32>
    %cst_199 = arith.constant dense<0.000000e+00> : vector<8xf32>
    %444 = vector.multi_reduction <add>, %443, %cst_199 [1] : vector<8x32xf32> to vector<8xf32>
    %445 = vector.shape_cast %444 : vector<8xf32> to vector<8x1xf32>
    %cst_200 = arith.constant 3.200000e+01 : f32
    %446 = vector.broadcast %cst_200 : f32 to vector<8x1xf32>
    %447 = arith.divf %445, %446 : vector<8x1xf32>
    %448 = vector.broadcast %440 : vector<8x1xf32> to vector<8x32xf32>
    %449 = arith.subf %434, %448 : vector<8x32xf32>
    %cst_201 = arith.constant 9.99999974E-6 : f32
    %450 = vector.broadcast %cst_201 : f32 to vector<8x1xf32>
    %451 = arith.addf %447, %450 : vector<8x1xf32>
    %452 = math.rsqrt %451 : vector<8x1xf32>
    %453 = vector.broadcast %452 : vector<8x1xf32> to vector<8x32xf32>
    %454 = arith.mulf %449, %453 : vector<8x32xf32>
    %455 = vector.broadcast %435 : vector<1x32xf32> to vector<8x32xf32>
    %456 = arith.mulf %454, %455 : vector<8x32xf32>
    %457 = vector.broadcast %436 : vector<1x32xf32> to vector<8x32xf32>
    %458 = arith.addf %456, %457 : vector<8x32xf32>
    %c0_202 = arith.constant 0 : index
    %c0_203 = arith.constant 0 : index
    %459 = vector.load %arg20[%c0_202, %c0_203] : memref<1x128xf32, #tpu.memory_space<vmem>>, vector<1x128xf32>
    %c0_204 = arith.constant 0 : index
    %c0_205 = arith.constant 0 : index
    %460 = vector.load %arg19[%c0_204, %c0_205] : memref<256x128xf32, #tpu.memory_space<vmem>>, vector<32x128xf32>
    %461 = vector.extract_strided_slice %458 {offsets = [0, 0], sizes = [1, 32], strides = [1, 1]} : vector<8x32xf32> to vector<1x32xf32>
    %cst_206 = arith.constant dense<0.000000e+00> : vector<1x128xf32>
    %462 = tpu.matmul %461, %460, %cst_206 {dimension_numbers = #tpu.dot_dimension_numbers<[1], [0], [0], [1], [0, 0, 1, 1], [], []>} : vector<1x32xf32>, vector<32x128xf32>, vector<1x128xf32> -> vector<1x128xf32>
    %463 = arith.addf %459, %462 : vector<1x128xf32>
    %c32 = arith.constant 32 : index
    %c0_207 = arith.constant 0 : index
    %464 = vector.load %arg19[%c32, %c0_207] : memref<256x128xf32, #tpu.memory_space<vmem>>, vector<32x128xf32>
    %465 = vector.extract_strided_slice %458 {offsets = [1, 0], sizes = [1, 32], strides = [1, 1]} : vector<8x32xf32> to vector<1x32xf32>
    %cst_208 = arith.constant dense<0.000000e+00> : vector<1x128xf32>
    %466 = tpu.matmul %465, %464, %cst_208 {dimension_numbers = #tpu.dot_dimension_numbers<[1], [0], [0], [1], [0, 0, 1, 1], [], []>} : vector<1x32xf32>, vector<32x128xf32>, vector<1x128xf32> -> vector<1x128xf32>
    %467 = arith.addf %463, %466 : vector<1x128xf32>
    %c64 = arith.constant 64 : index
    %c0_209 = arith.constant 0 : index
    %468 = vector.load %arg19[%c64, %c0_209] : memref<256x128xf32, #tpu.memory_space<vmem>>, vector<32x128xf32>
    %469 = vector.extract_strided_slice %458 {offsets = [2, 0], sizes = [1, 32], strides = [1, 1]} : vector<8x32xf32> to vector<1x32xf32>
    %cst_210 = arith.constant dense<0.000000e+00> : vector<1x128xf32>
    %470 = tpu.matmul %469, %468, %cst_210 {dimension_numbers = #tpu.dot_dimension_numbers<[1], [0], [0], [1], [0, 0, 1, 1], [], []>} : vector<1x32xf32>, vector<32x128xf32>, vector<1x128xf32> -> vector<1x128xf32>
    %471 = arith.addf %467, %470 : vector<1x128xf32>
    %c96 = arith.constant 96 : index
    %c0_211 = arith.constant 0 : index
    %472 = vector.load %arg19[%c96, %c0_211] : memref<256x128xf32, #tpu.memory_space<vmem>>, vector<32x128xf32>
    %473 = vector.extract_strided_slice %458 {offsets = [3, 0], sizes = [1, 32], strides = [1, 1]} : vector<8x32xf32> to vector<1x32xf32>
    %cst_212 = arith.constant dense<0.000000e+00> : vector<1x128xf32>
    %474 = tpu.matmul %473, %472, %cst_212 {dimension_numbers = #tpu.dot_dimension_numbers<[1], [0], [0], [1], [0, 0, 1, 1], [], []>} : vector<1x32xf32>, vector<32x128xf32>, vector<1x128xf32> -> vector<1x128xf32>
    %475 = arith.addf %471, %474 : vector<1x128xf32>
    %c128 = arith.constant 128 : index
    %c0_213 = arith.constant 0 : index
    %476 = vector.load %arg19[%c128, %c0_213] : memref<256x128xf32, #tpu.memory_space<vmem>>, vector<32x128xf32>
    %477 = vector.extract_strided_slice %458 {offsets = [4, 0], sizes = [1, 32], strides = [1, 1]} : vector<8x32xf32> to vector<1x32xf32>
    %cst_214 = arith.constant dense<0.000000e+00> : vector<1x128xf32>
    %478 = tpu.matmul %477, %476, %cst_214 {dimension_numbers = #tpu.dot_dimension_numbers<[1], [0], [0], [1], [0, 0, 1, 1], [], []>} : vector<1x32xf32>, vector<32x128xf32>, vector<1x128xf32> -> vector<1x128xf32>
    %479 = arith.addf %475, %478 : vector<1x128xf32>
    %c160 = arith.constant 160 : index
    %c0_215 = arith.constant 0 : index
    %480 = vector.load %arg19[%c160, %c0_215] : memref<256x128xf32, #tpu.memory_space<vmem>>, vector<32x128xf32>
    %481 = vector.extract_strided_slice %458 {offsets = [5, 0], sizes = [1, 32], strides = [1, 1]} : vector<8x32xf32> to vector<1x32xf32>
    %cst_216 = arith.constant dense<0.000000e+00> : vector<1x128xf32>
    %482 = tpu.matmul %481, %480, %cst_216 {dimension_numbers = #tpu.dot_dimension_numbers<[1], [0], [0], [1], [0, 0, 1, 1], [], []>} : vector<1x32xf32>, vector<32x128xf32>, vector<1x128xf32> -> vector<1x128xf32>
    %483 = arith.addf %479, %482 : vector<1x128xf32>
    %c192 = arith.constant 192 : index
    %c0_217 = arith.constant 0 : index
    %484 = vector.load %arg19[%c192, %c0_217] : memref<256x128xf32, #tpu.memory_space<vmem>>, vector<32x128xf32>
    %485 = vector.extract_strided_slice %458 {offsets = [6, 0], sizes = [1, 32], strides = [1, 1]} : vector<8x32xf32> to vector<1x32xf32>
    %cst_218 = arith.constant dense<0.000000e+00> : vector<1x128xf32>
    %486 = tpu.matmul %485, %484, %cst_218 {dimension_numbers = #tpu.dot_dimension_numbers<[1], [0], [0], [1], [0, 0, 1, 1], [], []>} : vector<1x32xf32>, vector<32x128xf32>, vector<1x128xf32> -> vector<1x128xf32>
    %487 = arith.addf %483, %486 : vector<1x128xf32>
    %c224 = arith.constant 224 : index
    %c0_219 = arith.constant 0 : index
    %488 = vector.load %arg19[%c224, %c0_219] : memref<256x128xf32, #tpu.memory_space<vmem>>, vector<32x128xf32>
    %489 = vector.extract_strided_slice %458 {offsets = [7, 0], sizes = [1, 32], strides = [1, 1]} : vector<8x32xf32> to vector<1x32xf32>
    %cst_220 = arith.constant dense<0.000000e+00> : vector<1x128xf32>
    %490 = tpu.matmul %489, %488, %cst_220 {dimension_numbers = #tpu.dot_dimension_numbers<[1], [0], [0], [1], [0, 0, 1, 1], [], []>} : vector<1x32xf32>, vector<32x128xf32>, vector<1x128xf32> -> vector<1x128xf32>
    %491 = arith.addf %487, %490 : vector<1x128xf32>
    %c0_221 = arith.constant 0 : index
    %c0_222 = arith.constant 0 : index
    %c0_223 = arith.constant 0 : index
    %492 = vector.load %arg21[%c0_221, %c0_222, %c0_223] : memref<1x1x128xf32, #tpu.memory_space<vmem>>, vector<1x1x128xf32>
    %493 = vector.shape_cast %492 : vector<1x1x128xf32> to vector<1x128xf32>
    %494 = vector.shape_cast %491 : vector<1x128xf32> to vector<1x1x128xf32>
    tpu.vector_store %arg21[%c0_221, %c0_222, %c0_223], %494 {strides = array<i32>} : memref<1x1x128xf32, #tpu.memory_space<vmem>>, vector<1x1x128xf32>,
    return
  }
  func.func @transform_0(%arg0: i32) -> (i32, i32) {
    %c0_i32 = arith.constant 0 : i32
    %c0_i32_0 = arith.constant 0 : i32
    return %arg0, %c0_i32 : i32, i32
  }
  func.func @transform_1(%arg0: i32) -> (i32, i32) {
    %c0_i32 = arith.constant 0 : i32
    %c0_i32_0 = arith.constant 0 : i32
    %c0_i32_1 = arith.constant 0 : i32
    return %c0_i32, %c0_i32_0 : i32, i32
  }
  func.func @transform_2(%arg0: i32) -> (i32, i32) {
    %c0_i32 = arith.constant 0 : i32
    %c0_i32_0 = arith.constant 0 : i32
    %c0_i32_1 = arith.constant 0 : i32
    return %c0_i32, %c0_i32_0 : i32, i32
  }
  func.func @transform_3(%arg0: i32) -> (i32, i32) {
    %c0_i32 = arith.constant 0 : i32
    %c0_i32_0 = arith.constant 0 : i32
    %c0_i32_1 = arith.constant 0 : i32
    return %c0_i32, %c0_i32_0 : i32, i32
  }
  func.func @transform_4(%arg0: i32) -> (i32, i32, i32) {
    %c0_i32 = arith.constant 0 : i32
    %c0_i32_0 = arith.constant 0 : i32
    %c0_i32_1 = arith.constant 0 : i32
    %c0_i32_2 = arith.constant 0 : i32
    return %c0_i32, %c0_i32_0, %c0_i32_1 : i32, i32, i32
  }
  func.func @transform_5(%arg0: i32) -> (i32, i32, i32) {
    %c0_i32 = arith.constant 0 : i32
    %c0_i32_0 = arith.constant 0 : i32
    %c0_i32_1 = arith.constant 0 : i32
    %c0_i32_2 = arith.constant 0 : i32
    return %c0_i32, %c0_i32_0, %c0_i32_1 : i32, i32, i32
  }
  func.func @transform_6(%arg0: i32) -> (i32, i32, i32) {
    %c0_i32 = arith.constant 0 : i32
    %c0_i32_0 = arith.constant 0 : i32
    %c0_i32_1 = arith.constant 0 : i32
    %c0_i32_2 = arith.constant 0 : i32
    return %c0_i32, %c0_i32_0, %c0_i32_1 : i32, i32, i32
  }
  func.func @transform_7(%arg0: i32) -> (i32, i32, i32) {
    %c0_i32 = arith.constant 0 : i32
    %c0_i32_0 = arith.constant 0 : i32
    %c0_i32_1 = arith.constant 0 : i32
    %c0_i32_2 = arith.constant 0 : i32
    return %c0_i32, %c0_i32_0, %c0_i32_1 : i32, i32, i32
  }
  func.func @transform_8(%arg0: i32) -> (i32, i32, i32) {
    %c0_i32 = arith.constant 0 : i32
    %c0_i32_0 = arith.constant 0 : i32
    %c0_i32_1 = arith.constant 0 : i32
    %c0_i32_2 = arith.constant 0 : i32
    return %c0_i32, %c0_i32_0, %c0_i32_1 : i32, i32, i32
  }
  func.func @transform_9(%arg0: i32) -> (i32, i32, i32) {
    %c0_i32 = arith.constant 0 : i32
    %c0_i32_0 = arith.constant 0 : i32
    %c0_i32_1 = arith.constant 0 : i32
    %c0_i32_2 = arith.constant 0 : i32
    return %c0_i32, %c0_i32_0, %c0_i32_1 : i32, i32, i32
  }
  func.func @transform_10(%arg0: i32) -> (i32, i32, i32) {
    %c0_i32 = arith.constant 0 : i32
    %c0_i32_0 = arith.constant 0 : i32
    %c0_i32_1 = arith.constant 0 : i32
    %c0_i32_2 = arith.constant 0 : i32
    return %c0_i32, %c0_i32_0, %c0_i32_1 : i32, i32, i32
  }
  func.func @transform_11(%arg0: i32) -> (i32, i32, i32) {
    %c0_i32 = arith.constant 0 : i32
    %c0_i32_0 = arith.constant 0 : i32
    %c0_i32_1 = arith.constant 0 : i32
    %c0_i32_2 = arith.constant 0 : i32
    return %c0_i32, %c0_i32_0, %c0_i32_1 : i32, i32, i32
  }
  func.func @transform_12(%arg0: i32) -> (i32, i32, i32) {
    %c0_i32 = arith.constant 0 : i32
    %c0_i32_0 = arith.constant 0 : i32
    %c0_i32_1 = arith.constant 0 : i32
    %c0_i32_2 = arith.constant 0 : i32
    return %c0_i32, %c0_i32_0, %c0_i32_1 : i32, i32, i32
  }
  func.func @transform_13(%arg0: i32) -> (i32, i32, i32) {
    %c0_i32 = arith.constant 0 : i32
    %c0_i32_0 = arith.constant 0 : i32
    %c0_i32_1 = arith.constant 0 : i32
    %c0_i32_2 = arith.constant 0 : i32
    return %c0_i32, %c0_i32_0, %c0_i32_1 : i32, i32, i32
  }
  func.func @transform_14(%arg0: i32) -> (i32, i32, i32) {
    %c0_i32 = arith.constant 0 : i32
    %c0_i32_0 = arith.constant 0 : i32
    %c0_i32_1 = arith.constant 0 : i32
    %c0_i32_2 = arith.constant 0 : i32
    return %c0_i32, %c0_i32_0, %c0_i32_1 : i32, i32, i32
  }
  func.func @transform_15(%arg0: i32) -> (i32, i32, i32) {
    %c0_i32 = arith.constant 0 : i32
    %c0_i32_0 = arith.constant 0 : i32
    %c0_i32_1 = arith.constant 0 : i32
    %c0_i32_2 = arith.constant 0 : i32
    return %c0_i32, %c0_i32_0, %c0_i32_1 : i32, i32, i32
  }
  func.func @transform_16(%arg0: i32) -> (i32, i32) {
    %c0_i32 = arith.constant 0 : i32
    %c0_i32_0 = arith.constant 0 : i32
    %c0_i32_1 = arith.constant 0 : i32
    return %c0_i32, %c0_i32_0 : i32, i32
  }
  func.func @transform_17(%arg0: i32) -> (i32, i32) {
    %c0_i32 = arith.constant 0 : i32
    %c0_i32_0 = arith.constant 0 : i32
    %c0_i32_1 = arith.constant 0 : i32
    return %c0_i32, %c0_i32_0 : i32, i32
  }
  func.func @transform_18(%arg0: i32) -> (i32, i32) {
    %c0_i32 = arith.constant 0 : i32
    %c0_i32_0 = arith.constant 0 : i32
    %c0_i32_1 = arith.constant 0 : i32
    return %c0_i32, %c0_i32_0 : i32, i32
  }
  func.func @transform_19(%arg0: i32) -> (i32, i32) {
    %c0_i32 = arith.constant 0 : i32
    %c0_i32_0 = arith.constant 0 : i32
    %c0_i32_1 = arith.constant 0 : i32
    return %c0_i32, %c0_i32_0 : i32, i32
  }
  func.func @transform_20(%arg0: i32) -> (i32, i32, i32) {
    %c0_i32 = arith.constant 0 : i32
    %c0_i32_0 = arith.constant 0 : i32
    %c0_i32_1 = arith.constant 0 : i32
    return %arg0, %c0_i32, %c0_i32_0 : i32, i32, i32
  }
}

</mosaic_0001>

<bundles_post_ra>
// kernel: _lambda_.1
= control target key start
LH: loop header
LB: loop body
LE: loop exit
PB: predicated region body
PF: predicated region fallthrough
CT: control target
= control target key end

     0   :  { %s5992_s0 = inlined_call_operand.vmem [shape: f32[16,32], index: 0, kind: input, shape index: {}]   ;;  %s5993_s1 = inlined_call_operand.vmem [shape: f32[8,96], index: 1, kind: input, shape index: {}]   ;;  %s5994_s2 = inlined_call_operand.vmem [shape: f32[8,96], index: 2, kind: input, shape index: {}]   ;;  %s5995_s3 = inlined_call_operand.vmem [shape: f32[96,96], index: 3, kind: input, shape index: {}]   ;;  %s5996_s4 = inlined_call_operand.vmem [shape: f32[2,1,32], index: 4, kind: input, shape index: {}, may-alias: {4,6}]   ;;  %s5997_s5 = inlined_call_operand.vmem [shape: f32[2,1,32], index: 5, kind: input, shape index: {}, may-alias: {5,7}]   ;;  %s5998_s6 = inlined_call_operand.vmem [shape: f32[2,1,32], index: 6, kind: input, shape index: {}, may-alias: {4,6}]   ;;  %s5999_s7 = inlined_call_operand.vmem [shape: f32[2,1,32], index: 7, kind: input, shape index: {}, may-alias: {5,7}]   ;;  %s6000_s8 = inlined_call_operand.vmem [shape: f32[2,32,96], index: 8, kind: input, shape index: {}]   ;;  %s6001_s9 = inlined_call_operand.vmem [shape: f32[2,1,96], index: 9, kind: input, shape index: {}]   ;;  %s6002_s10 = inlined_call_operand.vmem [shape: f32[2,32,32], index: 10, kind: input, shape index: {}]   ;;  %s6003_s11 = inlined_call_operand.vmem [shape: f32[2,1,32], index: 11, kind: input, shape index: {}]   ;;  %s6004_s12 = inlined_call_operand.vmem [shape: f32[2,32,128], index: 12, kind: input, shape index: {}]   ;;  %s6005_s13 = inlined_call_operand.vmem [shape: f32[2,1,128], index: 13, kind: input, shape index: {}]   ;;  %s6006_s14 = inlined_call_operand.vmem [shape: f32[2,128,32], index: 14, kind: input, shape index: {}]   ;;  %s6007_s15 = inlined_call_operand.vmem [shape: f32[2,1,32], index: 15, kind: input, shape index: {}]   ;;  %s6008_s16 = inlined_call_operand.vmem [shape: f32[1,32], index: 16, kind: input, shape index: {}]   ;;  %s6009_s17 = inlined_call_operand.vmem [shape: f32[1,32], index: 17, kind: input, shape index: {}]   ;;  %s6010_s18 = inlined_call_operand.vmem [shape: f32[256,128], index: 18, kind: input, shape index: {}]   ;;  %s6011_s19 = inlined_call_operand.vmem [shape: f32[1,128], index: 19, kind: input, shape index: {}]   ;;  %s6012_s20 = inlined_call_operand.hbm [shape: f32[2,1,128], index: 20, kind: output, shape index: {}]  }
   0x1   :  { %6030 = sst [smem:[#allocation8_spill]] %s5992_s0 }
   0x2   :  { %6031 = sst [smem:[#allocation9_spill]] %s5993_s1 }
   0x3   :  { %6032 = sst [smem:[#allocation10_spill]] %s5994_s2 }
   0x4   :  { %6033 = sst [smem:[#allocation11_spill]] %s5995_s3 }
   0x5   :  { %6034 = sst [smem:[#allocation12_spill]] %s5996_s4 }
   0x6   :  { %6035 = sst [smem:[#allocation13_spill]] %s5997_s5 }
   0x7   :  { %6036 = sst [smem:[#allocation14_spill]] %s5998_s6 }
   0x8   :  { %6037 = sst [smem:[#allocation15_spill]] %s5999_s7 }
   0x9   :  { %25 = vsyncpa [#allocation3], 0 }
   0xa   :  { %27 = vsyncpa [#allocation3 + $0x1], 0  ;;  %s5086_s1 = smov 0   ;;  %s5088_s22 = smov 0  }
   0xb   :  { %s5090_s23 = smov 0   ;;  %s5092_s24 = smov 0  }
   0xc LB: > { %6038 = sst [smem:[#allocation5_spill]] %s4961_s23  ;;  %s5107_s2 = sadd.s32 4294967295, %s4965_s24   ;;  %s4965_s24 = sphi %s5092_s24, %s6064_s24   ;;  %s4961_s23 = sphi %s5090_s23, %s6066_s23   ;;  %s4957_s22 = sphi %s5088_s22, %s6068_s22   ;;  %s4953_s1 = sphi %s5086_s1, %s6067_s1  }
   0xd   : > { %s4151_s25 = sadd.s32 4294967294, %s4965_s24   ;;  %s5111_s3 = sadd.s32 1, %s4965_s24  }
   0xe   : > { %6039 = sst [smem:[#allocation6_spill]] %s5111_s3  ;;  %s465_s26 = sadd.s32 1, %s4961_s23 }
   0xf   : > { %s462_s27 = ssub.s32 %s4965_s24, %s5111_s3  ;;  %p475_p0 = scmp.ne.s32.totalorder %s4961_s23, %s4957_s22 }
  0x10   : > { %p463_p1 = scmp.eq.s32.totalorder %s462_s27, 0  ;;  %p476_p2 = scmp.eq.s32.totalorder %s5107_s2, 1 }
  0x11   : > { %p481_p3 = scmp.ne.s32.totalorder %s4957_s22, %s4953_s1  ;;  %p482_p4 = scmp.eq.s32.totalorder %s4151_s25, 1 }
  0x12   : > { %s5122_s28 = scalar_select %p463_p1, %s4961_s23, %s465_s26  }
  0x13   : > { %p5124_p5 = por %p476_p2, %p475_p0  ;;  %p5128_p6 = por %p482_p4, %p481_p3 }
  0x14   : > { %6040 = sst [smem:[#allocation7_spill]] %s5122_s28  ;;  %p4154_p7 = scmp.ge.s32.totalorder %s4965_s24, 1 }
  0x15   : > { %p564_p8 = scmp.lt.s32.totalorder %s4965_s24, 3 }
  0x17   : > { %p565_p9 = pnand %p4154_p7, %p564_p8 }
  0x18   : > { %p620_p10 = scmp.lt.s32.totalorder (!%p565_p9), %s5107_s2, 1  ;;  %s6043_s26 = sld [smem:[#allocation8_spill]] (!%p565_p9) }
  0x19   : > { %568 = sbr.rel (%p565_p9) target bundleno = 6015 (0x177f), region = 100  ;;  %s6044_s21 = sld [smem:[#allocation11_spill]] (!%p565_p9) }
  0x1a   : > { %s6045_s28 = sld [smem:[#allocation12_spill]] (!%p565_p9)  ;;  %s6029_s23 = smov (!%p565_p9), 96  }
  0x1b   : > { %s6046_s5 = sld [smem:[#allocation13_spill]] (!%p565_p9) }
  0x1c   : > { %s6047_s25 = sld [smem:[#allocation9_spill]] (!%p565_p9) }
  0x1d   : > { %s6048_s3 = sld [smem:[#allocation10_spill]] (!%p565_p9) }
  0x1e   : > { %s621_s30 = scalar_select %p620_p10, %s5107_s2, 1  ;;  %vm646_vm0 = vcmask 261120   ;;  %v678_v7 = vld [vmem:[%s6000_s8 + $0x18] sm:$0xff]  ;;  %v4967_v8 = vmov 0.0   ;;  %v677_v9 = vld [vmem:[%s6000_s8 + $0x10] sm:$0xff]  ;;  %vm4968_vm1 = vmmov 0   ;;  %v624_v46 = vlaneseq }
  0x1f   : > { %4431 = vmatprep.subr.mxu0 %v4967_v8  ;;  %4439 = vmatprep.mubr.msk.f32.mxu0 %vm4968_vm1, %v4967_v8  ;;  %v676_v10 = vld [vmem:[%s6000_s8 + $0x8] sm:$0xff]  ;;  %v675_v11 = vld [vmem:[%s6000_s8] sm:$0xff]  ;;  %v5170_v12 = vld [vmem:[%s6044_s21 + $0x58] sm:$0xff]  ;;  %vm760_vm2 = vcmask 785408   ;;  %vm843_vm3 = vcmask 64512   ;;  %s6051_s6 = sld [smem:[#allocation14_spill]] }
  0x20   : > { %s4155_s0 = sshll.u32 %s621_s30, 3  ;;  %4432 = vmatpush3.msra.mxu0 %v678_v7  ;;  %4442 = vmatprep.subr.mxu1 %v4967_v8  ;;  %v5175_v13 = vld [vmem:[%s6044_s21 + $0x50] sm:$0xff]  ;;  %v5182_v14 = vld [vmem:[%s6044_s21 + $0x48] sm:$0xff]  ;;  %v5189_v15 = vld [vmem:[%s6044_s21 + $0x40] sm:$0xff]  ;;  %s6024_s30 = smov 120   ;;  %v625_v47 = vshrl.u32 %v624_v46, 7 }
  0x21   : > { %s623_s27 = scalar_lea.vmem %s6043_s26, %s4155_s0  ;;  %4433 = vmatprep.subr.mxu0 %v4967_v8  ;;  %4466 = vmatprep.mubr.msk.f32.mxu1 %vm4968_vm1, %v4967_v8  ;;  %v5196_v16 = vld [vmem:[%s6044_s21 + $0x38] sm:$0xff]  ;;  %v5203_v17 = vld [vmem:[%s6044_s21 + $0x30] sm:$0xff]  ;;  %v5210_v18 = vld [vmem:[%s6044_s21 + $0x28] sm:$0xff]  ;;  %v627_v48 = vand.u32 127, %v624_v46  ;;  %s6020_s0 = smov 72  }
  0x22   : > { %v5139_v0 = vld [vmem:[%s623_s27] sm:$0xff]  ;;  %4434 = vmatpush3.msra.mxu0 %v677_v9  ;;  %4443 = vmatpush3.msra.mxu1 %v5170_v12  ;;  %v5224_v20 = vld [vmem:[%s6044_s21 + $0x18] sm:$0xff]  ;;  %v5231_v21 = vld [vmem:[%s6044_s21 + $0x10] sm:$0xff]  ;;  %s6022_s27 = smov 112   ;;  %s6028_s26 = smov 64  }
  0x23   : > { %v647_v1 = vsel %vm646_vm0, %v5139_v0, 0.0  ;;  %4435 = vmatprep.subr.mxu0 %v4967_v8  ;;  %4444 = vmatprep.subr.mxu1 %v4967_v8  ;;  %v5217_v19 = vld [vmem:[%s6044_s21 + $0x20] sm:$0xff]  ;;  %v5252_v31 = vld [vmem:[%s6044_s21 + $0x8] sm:$0xff]  ;;  %vm5298_vm4 = vcmp.le.s32.totalorder %v627_v48, %v625_v47  ;;  %s6052_s7 = sld [smem:[#allocation15_spill]] }
  0x24   : > { %648 = vadd.xlane.f32.xlu0 %v647_v1  ;;  %4436 = vmatpush3.msra.mxu0 %v676_v10  ;;  %v4156_v26 = vld [vmem:[%s6045_s28] ss:$0 sm:$0xff] }
  0x25   : > { %4437 = vmatprep.subr.mxu0 %v4967_v8  ;;  %4445 = vmatpush3.msra.mxu1 %v5175_v13  ;;  %v4157_v28 = vld [vmem:[%s6046_s5] ss:$0 sm:$0xff] }
  0x26   : > { %4438 = vmatpush3.msra.mxu0 %v675_v11  ;;  %4446 = vmatprep.subr.mxu1 %v4967_v8  ;;  %v5259_v32 = vld [vmem:[%s6044_s21] sm:$0xff]  ;;  %s6021_s21 = smov 88  }
  0x27   : > { %4474 = vmatprep.subr.mxu0 %v4967_v8  ;;  %4447 = vmatpush3.msra.mxu1 %v5182_v14  ;;  %v4158_v33 = vld [vmem:[%s6001_s9] ss:$0 sm:$0xff] }
  0x28   : > { %4448 = vmatprep.subr.mxu1 %v4967_v8  ;;  %v5272_v37 = vld [vmem:[%s6047_s25] sm:$0xff]  ;;  %s6019_s25 = smov 80  }
  0x29   : > { %4449 = vmatpush3.msra.mxu1 %v5189_v15  ;;  %v5277_v38 = vld [vmem:[%s6048_s3] sm:$0xff]  ;;  %s6023_s3 = smov 104  }
  0x2a   : > { %4450 = vmatprep.subr.mxu1 %v4967_v8 }
  0x2b   : > { %4451 = vmatpush3.msra.mxu1 %v5196_v16 }
  0x2c   : > { %4452 = vmatprep.subr.mxu1 %v4967_v8 }
  0x2d   : > { %4453 = vmatpush3.msra.mxu1 %v5203_v17 }
  0x2e   : > { %4454 = vmatprep.subr.mxu1 %v4967_v8 }
  0x2f   : > { %4455 = vmatpush3.msra.mxu1 %v5210_v18 }
  0x30   : > { %4456 = vmatprep.subr.mxu1 %v4967_v8 }
  0x31   : > { %4457 = vmatpush3.msra.mxu1 %v5217_v19 }
  0x32   : > { %4458 = vmatprep.subr.mxu1 %v4967_v8 }
  0x33   : > { %4459 = vmatpush3.msra.mxu1 %v5224_v20 }
  0x34   : > { %4460 = vmatprep.subr.mxu1 %v4967_v8 }
  0x35   : > { %4461 = vmatpush3.msra.mxu1 %v5231_v21 }
  0x36   : > { %4462 = vmatprep.subr.mxu1 %v4967_v8 }
  0x37   : > { %4463 = vmatpush3.msra.mxu1 %v5252_v31 }
  0x38   : > { %4464 = vmatprep.subr.mxu1 %v4967_v8 }
  0x39   : > { %4465 = vmatpush3.msra.mxu1 %v5259_v32 }
  0x3a   : > { %4469 = vmatprep.subr.mxu1 %v4967_v8 }
  0xad   : > { %v649_v2 = vpop.xlane.xlu0 %648 }
  0xae   : > { %v651_v3 = vmul.f32 0.03125, %v649_v2 }
  0xb0   : > { %v652_v4 = vsub.f32 %v5139_v0, %v651_v3 }
  0xb2   : > { %v653_v5 = vmul.f32 %v652_v4, %v652_v4 }
  0xb4   : > { %v654_v6 = vsel %vm646_vm0, %v653_v5, 0.0 }
  0xb5   : > { %655 = vadd.xlane.f32.xlu0 %v654_v6 }
 0x13e   : > { %v656_v22 = vpop.xlane.xlu0 %655 }
 0x13f   : > { %v657_v23 = vmul.f32 0.03125, %v656_v22 }
 0x141   : > { %v658_v24 = vadd.f32 1e-05, %v657_v23  ;;  %v836_v23 = vld [vmem:[%s6002_s10] sm:$0xff] }
 0x143   : > { %4859 = vrsqrt.f32 %v658_v24  ;;  %v837_v24 = vld [vmem:[%s6002_s10 + $0x8] sm:$0xff] }
 0x150   : > { %v4860_v25 = vpop.eup %4859 }
 0x151   : > { %v5240_v27 = vmul.f32 %v4860_v25, %v652_v4 }
 0x153   : > { %v667_v29 = vmul.f32 %v4156_v26, %v5240_v27 }
 0x155   : > { %v674_v30 = vadd.f32 %v4157_v28, %v667_v29 }
 0x157   : > { %4440 = vmatmul.mubr.msk.f32.vlgmr.msra.gmra.mxu0 %vm646_vm0, %v674_v30 }
 0x158   : > { %4476 = vmatprep.mubr.msk.f32.mxu0 %vm4968_vm1, %v4967_v8 }
 0x217   : > { %v755_v34 = vpop.f32.mrf.mxu0 }
 0x218   : > { %v756_v35 = vadd.f32 %v4158_v33, %v755_v34 }
 0x219   : > { %v4441_v36 = vpop.f32.mrf.mxu0 }
 0x21a   : > { %4467 = vmatmul.mubr.msk.f32.vlgmr.msra.gmra.mxu1 %vm760_vm2, %v756_v35  ;;  %v759_v40 = vmul.f32 %v756_v35, %v5272_v37 }
 0x21b   : > { %4471 = vmatprep.mubr.msk.f32.mxu1 %vm4968_vm1, %v4967_v8 }
 0x2da   : > { %v830_v39 = vpop.f32.mrf.mxu1 }
 0x2db   : > { %v834_v41 = vmul.f32 %v830_v39, %v5277_v38 }
 0x2dc   : > { %v4468_v42 = vpop.f32.mrf.mxu1 }
 0x2dd   : > { %v5281_v43 = vadd.f32 %v834_v41, %v759_v40 }
 0x2df   : > { %929 = vrot.lane.b32.xlu0 %v5281_v43, %s6022_s27  ;;  %841 = vrot.lane.b32.xlu1 %v5281_v43, %s6024_s30  ;;  %s6025_s27 = smov 56   ;;  %s6059_s30 = smov 80  }
 0x2e3   : > { %1009 = vrot.lane.b32.xlu0 %v5281_v43, %s6029_s23  ;;  %s6058_s23 = smov 72  }
 0x2e7   : > { %1007 = vrot.lane.b32.xlu0 %v5281_v43, %s6023_s3  ;;  %s6053_s3 = smov 96  }
 0x351   : > { %v930_v44 = vpop.permute.xlu0 %929  ;;  %v842_v45 = vpop.permute.xlu1 %841 }
 0x352   : > { %4470 = vmatpush3.xpose.msk.msra.mxu1 %vm843_vm3, %v842_v45  ;;  %4475 = vmatpush3.msra.mxu0 %v930_v44 }
 0x353   : > { %4479 = vmatprep.subr.mxu0 %v4967_v8  ;;  %4494 = vmatprep.subr.mxu1 %v4967_v8 }
 0x355   : > { %4472 = vmatmul.mubr.msk.f32.vlgmr.msra.gmra.mxu1 %vm843_vm3, %v5281_v43  ;;  %v1010_v58 = vpop.permute.xlu0 %1009 }
 0x356   : > { %4496 = vmatprep.mubr.msk.f32.mxu1 %vm4968_vm1, %v4967_v8  ;;  %4495 = vmatpush3.msra.mxu1 %v836_v23  ;;  %v1829_v23 = vld [vmem:[%s6004_s12 + $0x18] sm:$0xff] }
 0x357   : > { %4504 = vmatprep.subr.mxu1 %v4967_v8 }
 0x359   : > { %v1008_v60 = vpop.permute.xlu0 %1007 }
 0x415   : > { %v914_v49 = vpop.f32.mrf.mxu1 }
 0x416   : > { %v918_v51 = vmul.f32 0.35355338, %v914_v49 }
 0x417   : > { %v4473_v52 = vpop.f32.mrf.mxu1 }
 0x418   : > { %v919_v53 = vsel %vm5298_vm4, %v918_v51, -3.4028235e+38 }
 0x419   : > { %v920_v54 = vsel %vm843_vm3, %v919_v53, -inf }
 0x41a   : > { %921 = vmax.xlane.f32.xlu1 %v920_v54 }
 0x42b   : > { %1096 = vrot.lane.b32.xlu1 %v5281_v43, %s6021_s21  ;;  %s6026_s21 = smov 40  }
 0x4a3   : > { %v922_v55 = vpop.xlane.xlu1 %921 }
 0x4a4   : > { %v923_v56 = vsub.f32 %v919_v53, %v922_v55 }
 0x4a6   : > { %v924_v57 = vmul.f32 1.442695, %v923_v56 }
 0x4a7   : > { %v1097_v61 = vpop.permute.xlu1 %1096 }
 0x4a8   : > { %4861 = vpow2.f32 %v924_v57 }
 0x4b5   : > { %v4862_v59 = vpop.eup %4861 }
 0x4b6   : > { %4477 = vmatmul.mubr.msk.f32.vlgmr.msra.gmra.mxu0 %vm843_vm3, %v4862_v59  ;;  %v926_v22 = vsel %vm843_vm3, %v4862_v59, 0.0 }
 0x4b7   : > { %4480 = vmatpush3.xpose.msk.msra.mxu0 %vm843_vm3, %v1010_v58  ;;  %4481 = vmatprep.mubr.msk.f32.mxu0 %vm4968_vm1, %v4967_v8 }
 0x4b8   : > { %4484 = vmatprep.subr.mxu0 %v4967_v8 }
 0x4ba   : > { %4482 = vmatmul.mubr.msk.f32.vlgmr.msra.gmra.mxu0 %vm843_vm3, %v1008_v60  ;;  %v838_v60 = vld [vmem:[%s6002_s10 + $0x10] sm:$0xff] }
 0x4bb   : > { %4485 = vmatpush3.msra.mxu0 %v1097_v61  ;;  %4486 = vmatprep.mubr.msk.f32.mxu0 %vm4968_vm1, %v4967_v8 }
 0x4bc   : > { %4489 = vmatprep.subr.mxu0 %v4967_v8 }
 0x576   : > { %v1001_v62 = vpop.f32.mrf.mxu0 }
 0x578   : > { %v4478_v63 = vpop.f32.mrf.mxu0 }
 0x57a   : > { %v1081_v1 = vpop.f32.mrf.mxu0 }
 0x57b   : > { %v1085_v2 = vmul.f32 0.35355338, %v1081_v1 }
 0x57c   : > { %v4483_v3 = vpop.f32.mrf.mxu0 }
 0x57d   : > { %v1086_v4 = vsel %vm5298_vm4, %v1085_v2, -3.4028235e+38 }
 0x57e   : > { %v1087_v5 = vsel %vm843_vm3, %v1086_v4, -inf }
 0x57f   : > { %1088 = vmax.xlane.f32.xlu0 %v1087_v5 }
 0x595   : > { %1322 = vrot.lane.b32.xlu0 %v5281_v43, %s6020_s0  ;;  %s6056_s0 = smov 112  }
 0x599   : > { %1320 = vrot.lane.b32.xlu0 %v5281_v43, %s6019_s25  ;;  %s6027_s25 = smov 48  }
 0x608   : > { %v1089_v6 = vpop.xlane.xlu0 %1088 }
 0x609   : > { %v1090_v7 = vsub.f32 %v1086_v4, %v1089_v6 }
 0x60b   : > { %v1091_v9 = vmul.f32 1.442695, %v1090_v7 }
 0x60c   : > { %v1323_v34 = vpop.permute.xlu0 %1322 }
 0x60d   : > { %4863 = vpow2.f32 %v1091_v9 }
 0x610   : > { %v1321_v40 = vpop.permute.xlu0 %1320 }
 0x61a   : > { %v4864_v10 = vpop.eup %4863 }
 0x61b   : > { %4487 = vmatmul.mubr.msk.f32.vlgmr.msra.gmra.mxu0 %vm843_vm3, %v4864_v10  ;;  %v1093_v11 = vsel %vm843_vm3, %v4864_v10, 0.0 }
 0x61c   : > { %1094 = vadd.xlane.f32.xlu1 %v1093_v11  ;;  %4491 = vmatprep.mubr.msk.f32.mxu0 %vm4968_vm1, %v4967_v8 }
 0x61d   : > { %4490 = vmatpush3.msra.mxu0 %v837_v24 }
 0x61e   : > { %4499 = vmatprep.subr.mxu0 %v4967_v8 }
 0x620   : > { %927 = vadd.xlane.f32.xlu1 %v926_v22 }
 0x631   : > { %1409 = vrot.lane.b32.xlu1 %v5281_v43, %s6028_s26  ;;  %s6057_s26 = smov 88  }
 0x635   : > { %1563 = vrot.lane.b32.xlu1 %v5281_v43, %s6027_s25  ;;  %s6054_s25 = smov 120  }
 0x639   : > { %1561 = vrot.lane.b32.xlu1 %v5281_v43, %s6025_s27  ;;  %s6060_s27 = smov 64  }
 0x6a5   : > { %v1095_v25 = vpop.xlane.xlu1 %1094 }
 0x6a9   : > { %v928_v26 = vpop.xlane.xlu1 %927 }
 0x6aa   : > { %4865 = vrcp.f32 %v928_v26  ;;  %v1828_v26 = vld [vmem:[%s6004_s12 + $0x10] sm:$0xff] }
 0x6ab   : > { %4867 = vrcp.f32 %v1095_v25  ;;  %v4178_v25 = vld [vmem:[%s6051_s6] ss:$0 sm:$0xff] }
 0x6ad   : > { %v1410_v30 = vpop.permute.xlu1 %1409 }
 0x6b1   : > { %v1564_v56 = vpop.permute.xlu1 %1563 }
 0x6b5   : > { %v1562_v59 = vpop.permute.xlu1 %1561 }
 0x6b7   : > { %v4866_v28 = vpop.eup %4865 }
 0x6b8   : > { %v1006_v29 = vmul.f32 %v4866_v28, %v1001_v62  ;;  %v4868_v33 = vpop.eup %4867  ;;  %v1818_v28 = vmul.f32 %v4178_v25, %v5240_v27  ;;  %v1826_v27 = vld [vmem:[%s6004_s12] sm:$0xff] }
 0x6ba   : > { %4497 = vmatmul.mubr.msk.f32.vlgmr.msra.gmra.mxu1 %vm843_vm3, %v1006_v29  ;;  %v1827_v29 = vld [vmem:[%s6004_s12 + $0x8] sm:$0xff] }
 0x6bb   : > { %4505 = vmatpush3.msra.mxu1 %v1410_v30  ;;  %4506 = vmatprep.mubr.msk.f32.mxu1 %vm4968_vm1, %v4967_v8  ;;  %v4179_v30 = vld [vmem:[%s6052_s7] ss:$0 sm:$0xff] }
 0x6bc   : > { %4514 = vmatprep.subr.mxu1 %v4967_v8 }
 0x6db   : > { %v1168_v35 = vpop.f32.mrf.mxu0 }
 0x6dc   : > { %v1173_v36 = vmul.f32 %v4868_v33, %v1168_v35  ;;  %v1825_v33 = vadd.f32 %v4179_v30, %v1818_v28 }
 0x6dd   : > { %v4488_v39 = vpop.f32.mrf.mxu0 }
 0x6de   : > { %4492 = vmatmul.mubr.msk.f32.vlgmr.msra.gmra.mxu0 %vm843_vm3, %v1173_v36  ;;  %v839_v39 = vld [vmem:[%s6002_s10 + $0x18] sm:$0xff] }
 0x6df   : > { %4500 = vmatpush3.xpose.msk.msra.mxu0 %vm843_vm3, %v1323_v34  ;;  %4501 = vmatprep.mubr.msk.f32.mxu0 %vm4968_vm1, %v4967_v8 }
 0x6e0   : > { %4509 = vmatprep.subr.mxu0 %v4967_v8 }
 0x6e2   : > { %4502 = vmatmul.mubr.msk.f32.vlgmr.msra.gmra.mxu0 %vm843_vm3, %v1321_v40 }
 0x6e3   : > { %4511 = vmatprep.mubr.msk.f32.mxu0 %vm4968_vm1, %v4967_v8  ;;  %4510 = vmatpush3.msra.mxu0 %v838_v60 }
 0x6e4   : > { %4519 = vmatprep.subr.mxu0 %v4967_v8 }
 0x77a   : > { %v1316_v41 = vpop.f32.mrf.mxu1 }
 0x77c   : > { %v4498_v42 = vpop.f32.mrf.mxu1 }
 0x79e   : > { %v1243_v44 = vpop.f32.mrf.mxu0 }
 0x79f   : > { %v5354_v45 = vadd.f32 %v1316_v41, %v1243_v44 }
 0x7a0   : > { %v4493_v46 = vpop.f32.mrf.mxu0 }
 0x7a1   : > { %v1952_v46 = vld [vmem:[%s6006_s14 + $0x78] sm:$0xff] }
 0x7a2   : > { %v1394_v47 = vpop.f32.mrf.mxu0 }
 0x7a3   : > { %v1398_v48 = vmul.f32 0.35355338, %v1394_v47 }
 0x7a4   : > { %v4503_v49 = vpop.f32.mrf.mxu0 }
 0x7a5   : > { %v1399_v51 = vsel %vm5298_vm4, %v1398_v48, -3.4028235e+38  ;;  %v1950_v48 = vld [vmem:[%s6006_s14 + $0x68] sm:$0xff]  ;;  %v4180_v49 = vld [vmem:[%s6005_s13] ss:$0 sm:$0xff] }
 0x7a6   : > { %v1400_v52 = vsel %vm843_vm3, %v1399_v51, -inf }
 0x7a7   : > { %1401 = vmax.xlane.f32.xlu0 %v1400_v52 }
 0x830   : > { %v1402_v53 = vpop.xlane.xlu0 %1401 }
 0x831   : > { %v1403_v54 = vsub.f32 %v1399_v51, %v1402_v53  ;;  %v1949_v51 = vld [vmem:[%s6006_s14 + $0x60] sm:$0xff] }
 0x833   : > { %v1404_v55 = vmul.f32 1.442695, %v1403_v54  ;;  %v1948_v54 = vld [vmem:[%s6006_s14 + $0x58] sm:$0xff] }
 0x835   : > { %4869 = vpow2.f32 %v1404_v55 }
 0x842   : > { %v4870_v57 = vpop.eup %4869 }
 0x843   : > { %4507 = vmatmul.mubr.msk.f32.vlgmr.msra.gmra.mxu1 %vm843_vm3, %v4870_v57  ;;  %v1406_v58 = vsel %vm843_vm3, %v4870_v57, 0.0  ;;  %v1947_v57 = vld [vmem:[%s6006_s14 + $0x50] sm:$0xff] }
 0x844   : > { %4515 = vmatpush3.xpose.msk.msra.mxu1 %vm843_vm3, %v1564_v56  ;;  %1407 = vadd.xlane.f32.xlu1 %v1406_v58 }
 0x845   : > { %4516 = vmatprep.mubr.msk.f32.mxu1 %vm4968_vm1, %v4967_v8  ;;  %4524 = vmatprep.subr.mxu1 %v4967_v8 }
 0x847   : > { %4517 = vmatmul.mubr.msk.f32.vlgmr.msra.gmra.mxu1 %vm843_vm3, %v1562_v59  ;;  %v1946_v59 = vld [vmem:[%s6006_s14 + $0x48] sm:$0xff] }
 0x848   : > { %4526 = vmatprep.mubr.msk.f32.mxu1 %vm4968_vm1, %v4967_v8  ;;  %4525 = vmatpush3.msra.mxu1 %v839_v39 }
 0x849   : > { %4540 = vmatprep.subr.mxu1 %v4967_v8 }
 0x8cd   : > { %v1408_v61 = vpop.xlane.xlu1 %1407 }
 0x8ce   : > { %4871 = vrcp.f32 %v1408_v61  ;;  %v1945_v61 = vld [vmem:[%s6006_s14 + $0x40] sm:$0xff] }
 0x8db   : > { %v4872_v62 = vpop.eup %4871 }
 0x903   : > { %v1481_v63 = vpop.f32.mrf.mxu1 }
 0x904   : > { %v1486_v1 = vmul.f32 %v4872_v62, %v1481_v63  ;;  %v1944_v63 = vld [vmem:[%s6006_s14 + $0x38] sm:$0xff] }
 0x905   : > { %v4508_v2 = vpop.f32.mrf.mxu1 }
 0x906   : > { %4512 = vmatmul.mubr.msk.f32.vlgmr.msra.gmra.mxu0 %vm843_vm3, %v1486_v1  ;;  %v1943_v1 = vld [vmem:[%s6006_s14 + $0x30] sm:$0xff]  ;;  %v1942_v2 = vld [vmem:[%s6006_s14 + $0x28] sm:$0xff] }
 0x907   : > { %v1635_v3 = vpop.f32.mrf.mxu1  ;;  %4521 = vmatprep.mubr.msk.f32.mxu0 %vm4968_vm1, %v4967_v8 }
 0x908   : > { %v1639_v4 = vmul.f32 0.35355338, %v1635_v3  ;;  %v1941_v3 = vld [vmem:[%s6006_s14 + $0x20] sm:$0xff] }
 0x909   : > { %v4518_v5 = vpop.f32.mrf.mxu1 }
 0x90a   : > { %v1640_v6 = vsel %vm5298_vm4, %v1639_v4, -3.4028235e+38  ;;  %v1940_v5 = vld [vmem:[%s6006_s14 + $0x18] sm:$0xff] }
 0x90b   : > { %v1641_v7 = vsel %vm843_vm3, %v1640_v6, -inf }
 0x90c   : > { %1642 = vmax.xlane.f32.xlu0 %v1641_v7 }
 0x922   : > { %1650 = vrot.lane.b32.xlu0 %v5281_v43, %s6026_s21  ;;  %s6055_s21 = smov 104  }
 0x995   : > { %v1643_v9 = vpop.xlane.xlu0 %1642 }
 0x996   : > { %v1644_v10 = vsub.f32 %v1640_v6, %v1643_v9  ;;  %v1939_v6 = vld [vmem:[%s6006_s14 + $0x10] sm:$0xff]  ;;  %v1938_v9 = vld [vmem:[%s6006_s14 + $0x8] sm:$0xff] }
 0x998   : > { %v1645_v11 = vmul.f32 1.442695, %v1644_v10  ;;  %v1937_v10 = vld [vmem:[%s6006_s14] sm:$0xff] }
 0x999   : > { %v1651_v22 = vpop.permute.xlu0 %1650 }
 0x99a   : > { %4873 = vpow2.f32 %v1645_v11  ;;  %4520 = vmatpush3.msra.mxu0 %v1651_v22 }
 0x99b   : > { %4529 = vmatprep.subr.mxu0 %v4967_v8 }
 0x9a7   : > { %v4874_v24 = vpop.eup %4873 }
 0x9a8   : > { %4522 = vmatmul.mubr.msk.f32.vlgmr.msra.gmra.mxu0 %vm843_vm3, %v4874_v24  ;;  %v1647_v43 = vsel %vm843_vm3, %v4874_v24, 0.0 }
 0x9a9   : > { %4530 = vmatpush3.msra.mxu0 %v1829_v23  ;;  %1648 = vadd.xlane.f32.xlu0 %v1647_v43 }
 0x9aa   : > { %4531 = vmatprep.subr.mxu0 %v4967_v8  ;;  %4537 = vmatprep.mubr.msk.f32.mxu0 %vm4968_vm1, %v4967_v8 }
 0x9ab   : > { %4532 = vmatpush3.msra.mxu0 %v1828_v26 }
 0x9ac   : > { %4533 = vmatprep.subr.mxu0 %v4967_v8 }
 0x9ad   : > { %4534 = vmatpush3.msra.mxu0 %v1827_v29 }
 0x9ae   : > { %4535 = vmatprep.subr.mxu0 %v4967_v8 }
 0x9af   : > { %4536 = vmatpush3.msra.mxu0 %v1826_v27 }
 0x9b0   : > { %4538 = vmatmul.mubr.msk.f32.vlgmr.msra.gmra.mxu0 %vm646_vm0, %v1825_v33  ;;  %4575 = vmatprep.subr.mxu0 %v4967_v8 }
 0x9b1   : > { %4583 = vmatprep.mubr.msk.f32.mxu0 %vm4968_vm1, %v4967_v8 }
 0x9c6   : > { %v1556_v34 = vpop.f32.mrf.mxu0 }
 0x9c7   : > { %v5412_v35 = vadd.f32 %v1556_v34, %v5354_v45  ;;  %v1951_v45 = vld [vmem:[%s6006_s14 + $0x70] sm:$0xff] }
 0x9c8   : > { %v4513_v36 = vpop.f32.mrf.mxu0 }
 0xa32   : > { %v1649_v40 = vpop.xlane.xlu0 %1648 }
 0xa33   : > { %4875 = vrcp.f32 %v1649_v40 }
 0xa40   : > { %v4876_v41 = vpop.eup %4875 }
 0xa68   : > { %v1722_v42 = vpop.f32.mrf.mxu0 }
 0xa69   : > { %v1727_v44 = vmul.f32 %v4876_v41, %v1722_v42 }
 0xa6a   : > { %v4523_v47 = vpop.f32.mrf.mxu0 }
 0xa6b   : > { %4527 = vmatmul.mubr.msk.f32.vlgmr.msra.gmra.mxu1 %vm843_vm3, %v1727_v44 }
 0xa6c   : > { %4541 = vmatpush3.msra.mxu1 %v1952_v46  ;;  %4572 = vmatprep.mubr.msk.f32.mxu1 %vm4968_vm1, %v4967_v8 }
 0xa6d   : > { %4542 = vmatprep.subr.mxu1 %v4967_v8 }
 0xa6e   : > { %4543 = vmatpush3.msra.mxu1 %v1951_v45 }
 0xa6f   : > { %4544 = vmatprep.subr.mxu1 %v4967_v8 }
 0xa70   : > { %v1906_v52 = vpop.f32.mrf.mxu0  ;;  %4545 = vmatpush3.msra.mxu1 %v1950_v48  ;;  %v4177_v48 = vld [vmem:[%s6003_s11] ss:$0 sm:$0xff] }
 0xa71   : > { %v5438_v53 = vadd.f32 %v4180_v49, %v1906_v52  ;;  %4546 = vmatprep.subr.mxu1 %v4967_v8 }
 0xa72   : > { %v4539_v55 = vpop.f32.mrf.mxu0  ;;  %4547 = vmatpush3.msra.mxu1 %v1949_v51  ;;  %v4184_v51 = vld [vmem:[%s6007_s15] ss:$0 sm:$0xff] }
 0xa73   : > { %v1911_v56 = vmul.f32 0.70710677, %v5438_v53  ;;  %4548 = vmatprep.subr.mxu1 %v4967_v8  ;;  %v1910_v41 = vmul.f32 0.5, %v5438_v53 }
 0xa74   : > { %4549 = vmatpush3.msra.mxu1 %v1948_v54 }
 0xa75   : > { %v1912_v58 = vand.u32 2147483647, %v1911_v56  ;;  %4550 = vmatprep.subr.mxu1 %v4967_v8  ;;  %vm1932_vm5 = vcmp.lt.f32.partialorder %v1911_v56, 0.0 }
 0xa76   : > { %4551 = vmatpush3.msra.mxu1 %v1947_v57 }
 0xa77   : > { %v1913_v60 = vmul.f32 0.3275911, %v1912_v58  ;;  %4552 = vmatprep.subr.mxu1 %v4967_v8  ;;  %v1926_v4 = vsub.f32 0.0, %v1912_v58 }
 0xa78   : > { %4553 = vmatpush3.msra.mxu1 %v1946_v59 }
 0xa79   : > { %v1914_v62 = vadd.f32 1.0, %v1913_v60  ;;  %4554 = vmatprep.subr.mxu1 %v4967_v8  ;;  %v1927_v7 = vmul.f32 %v1926_v4, %v1912_v58 }
 0xa7a   : > { %4555 = vmatpush3.msra.mxu1 %v1945_v61 }
 0xa7b   : > { %4877 = vrcp.f32 %v1914_v62  ;;  %4556 = vmatprep.subr.mxu1 %v4967_v8  ;;  %v1928_v23 = vmul.f32 1.442695, %v1927_v7  ;;  %v4192_v62 = vld [vmem:[%s6000_s8 + $0x38] sm:$0xff] }
 0xa7c   : > { %4557 = vmatpush3.msra.mxu1 %v1944_v63  ;;  %4576 = vmatpush3.msra.mxu0 %v4192_v62  ;;  %v4190_v63 = vld [vmem:[%s6000_s8 + $0x28] sm:$0xff] }
 0xa7d   : > { %4558 = vmatprep.subr.mxu1 %v4967_v8  ;;  %4879 = vpow2.f32 %v1928_v23  ;;  %4577 = vmatprep.subr.mxu0 %v4967_v8 }
 0xa7e   : > { %4559 = vmatpush3.msra.mxu1 %v1943_v1  ;;  %v4189_v1 = vld [vmem:[%s6000_s8 + $0x20] sm:$0xff] }
 0xa7f   : > { %4560 = vmatprep.subr.mxu1 %v4967_v8 }
 0xa80   : > { %4561 = vmatpush3.msra.mxu1 %v1942_v2 }
 0xa81   : > { %4562 = vmatprep.subr.mxu1 %v4967_v8 }
 0xa82   : > { %4563 = vmatpush3.msra.mxu1 %v1941_v3 }
 0xa83   : > { %4564 = vmatprep.subr.mxu1 %v4967_v8 }
 0xa84   : > { %4565 = vmatpush3.msra.mxu1 %v1940_v5 }
 0xa85   : > { %4566 = vmatprep.subr.mxu1 %v4967_v8 }
 0xa86   : > { %4567 = vmatpush3.msra.mxu1 %v1939_v6  ;;  %v4187_v6 = vld [vmem:[%s6045_s28 + $0x1] ss:$0 sm:$0xff] }
 0xa87   : > { %4568 = vmatprep.subr.mxu1 %v4967_v8 }
 0xa88   : > { %v4878_v11 = vpop.eup %4877  ;;  %4569 = vmatpush3.msra.mxu1 %v1938_v9  ;;  %v4188_v9 = vld [vmem:[%s6046_s5 + $0x1] ss:$0 sm:$0xff] }
 0xa89   : > { %v1917_v22 = vmul.f32 1.0614054, %v4878_v11  ;;  %4570 = vmatprep.subr.mxu1 %v4967_v8 }
 0xa8a   : > { %4571 = vmatpush3.msra.mxu1 %v1937_v10  ;;  %v4880_v33 = vpop.eup %4879 }
 0xa8b   : > { %v4182_v24 = vadd.f32 -1.4531521, %v1917_v22  ;;  %4613 = vmatprep.subr.mxu1 %v4967_v8 }
 0xa8d   : > { %v1919_v25 = vmul.f32 %v4878_v11, %v4182_v24 }
 0xa8f   : > { %v1920_v43 = vadd.f32 1.4214138, %v1919_v25 }
 0xa91   : > { %v1921_v26 = vmul.f32 %v4878_v11, %v1920_v43 }
 0xa93   : > { %v4183_v28 = vadd.f32 -0.28449672, %v1921_v26 }
 0xa95   : > { %v1923_v29 = vmul.f32 %v4878_v11, %v4183_v28 }
 0xa97   : > { %v1924_v30 = vadd.f32 0.2548296, %v1923_v29 }
 0xa99   : > { %v1925_v27 = vmul.f32 %v4878_v11, %v1924_v30 }
 0xa9b   : > { %v1930_v34 = vmul.f32 %v4880_v33, %v1925_v27 }
 0xa9d   : > { %v1931_v36 = vsub.f32 1.0, %v1930_v34 }
 0xa9f   : > { %v1933_v39 = vsub.f32 0.0, %v1931_v36 }
 0xaa1   : > { %v1934_v40 = vsel %vm1932_vm5, %v1933_v39, %v1931_v36 }
 0xaa2   : > { %v1935_v42 = vadd.f32 1.0, %v1934_v40 }
 0xaa4   : > { %v1936_v44 = vmul.f32 %v1935_v42, %v1910_v41 }
 0xaa6   : > { %4573 = vmatmul.mubr.f32.vlgmr.msra.gmra.mxu1 %v1936_v44 }
 0xaa7   : > { %4615 = vmatprep.mubr.msk.f32.mxu1 %vm4968_vm1, %v4967_v8 }
 0xb2b   : > { %v1797_v46 = vpop.f32.mrf.mxu1 }
 0xb2c   : > { %v1801_v45 = vadd.f32 %v1797_v46, %v5412_v35 }
 0xb2d   : > { %v4528_v47 = vpop.f32.mrf.mxu1 }
 0xb2e   : > { %v1809_v49 = vadd.f32 %v4177_v48, %v1801_v45  ;;  %v4197_v45 = vld [vmem:[%s6002_s10 + $0x20] sm:$0xff]  ;;  %v4198_v48 = vld [vmem:[%s6002_s10 + $0x28] sm:$0xff] }
 0xb30   : > { %v2030_v54 = vadd.f32 %v1809_v49, %v5139_v0  ;;  %v4191_v0 = vld [vmem:[%s6000_s8 + $0x30] sm:$0xff] }
 0xb31   : > { %4578 = vmatpush3.msra.mxu0 %v4191_v0 }
 0xb32   : > { %4579 = vmatprep.subr.mxu0 %v4967_v8 }
 0xb33   : > { %4580 = vmatpush3.msra.mxu0 %v4190_v63 }
 0xb34   : > { %4581 = vmatprep.subr.mxu0 %v4967_v8 }
 0xb35   : > { %4582 = vmatpush3.msra.mxu0 %v4189_v1 }
 0xb36   : > { %4586 = vmatprep.subr.mxu0 %v4967_v8 }
 0xb66   : > { %v2026_v52 = vpop.f32.mrf.mxu1 }
 0xb67   : > { %v2027_v53 = vadd.f32 %v4184_v51, %v2026_v52 }
 0xb68   : > { %v4574_v55 = vpop.f32.mrf.mxu1 }
 0xb69   : > { %v5502_v56 = vadd.f32 %v2030_v54, %v2027_v53 }
 0xb6b   : > { %v2036_v57 = vsel %vm646_vm0, %v5502_v56, 0.0 }
 0xb6c   : > { %2037 = vadd.xlane.f32.xlu1 %v2036_v57 }
 0xbf5   : > { %v2038_v35 = vpop.xlane.xlu1 %2037 }
 0xbf6   : > { %v2039_v58 = vmul.f32 0.03125, %v2038_v35 }
 0xbf8   : > { %v2040_v59 = vsub.f32 %v5502_v56, %v2039_v58 }
 0xbfa   : > { %v2041_v60 = vmul.f32 %v2040_v59, %v2040_v59 }
 0xbfc   : > { %v2042_v61 = vsel %vm646_vm0, %v2041_v60, 0.0 }
 0xbfd   : > { %2043 = vadd.xlane.f32.xlu1 %v2042_v61 }
 0xc86   : > { %v2044_v2 = vpop.xlane.xlu1 %2043 }
 0xc87   : > { %v2045_v3 = vmul.f32 0.03125, %v2044_v2 }
 0xc89   : > { %v2046_v4 = vadd.f32 1e-05, %v2045_v3 }
 0xc8b   : > { %4881 = vrsqrt.f32 %v2046_v4 }
 0xc98   : > { %v4882_v5 = vpop.eup %4881 }
 0xc99   : > { %v5527_v7 = vmul.f32 %v4882_v5, %v2040_v59 }
 0xc9b   : > { %v2055_v10 = vmul.f32 %v4187_v6, %v5527_v7 }
 0xc9d   : > { %v2062_v11 = vadd.f32 %v4188_v9, %v2055_v10 }
 0xc9f   : > { %4584 = vmatmul.mubr.msk.f32.vlgmr.msra.gmra.mxu0 %vm646_vm0, %v2062_v11 }
 0xca0   : > { %4587 = vmatpush3.msra.mxu0 %v5170_v12  ;;  %4610 = vmatprep.mubr.msk.f32.mxu0 %vm4968_vm1, %v4967_v8  ;;  %v4194_v12 = vld [vmem:[%s6001_s9 + $0x1] ss:$0 sm:$0xff] }
 0xca1   : > { %4588 = vmatprep.subr.mxu0 %v4967_v8 }
 0xca2   : > { %4589 = vmatpush3.msra.mxu0 %v5175_v13 }
 0xca3   : > { %4590 = vmatprep.subr.mxu0 %v4967_v8 }
 0xca4   : > { %4591 = vmatpush3.msra.mxu0 %v5182_v14 }
 0xca5   : > { %4592 = vmatprep.subr.mxu0 %v4967_v8 }
 0xca6   : > { %4593 = vmatpush3.msra.mxu0 %v5189_v15 }
 0xca7   : > { %4594 = vmatprep.subr.mxu0 %v4967_v8 }
 0xca8   : > { %4595 = vmatpush3.msra.mxu0 %v5196_v16 }
 0xca9   : > { %4596 = vmatprep.subr.mxu0 %v4967_v8 }
 0xcaa   : > { %4597 = vmatpush3.msra.mxu0 %v5203_v17 }
 0xcab   : > { %4598 = vmatprep.subr.mxu0 %v4967_v8 }
 0xcac   : > { %4599 = vmatpush3.msra.mxu0 %v5210_v18 }
 0xcad   : > { %4600 = vmatprep.subr.mxu0 %v4967_v8 }
 0xcae   : > { %4601 = vmatpush3.msra.mxu0 %v5217_v19 }
 0xcaf   : > { %4602 = vmatprep.subr.mxu0 %v4967_v8 }
 0xcb0   : > { %4603 = vmatpush3.msra.mxu0 %v5224_v20 }
 0xcb1   : > { %4604 = vmatprep.subr.mxu0 %v4967_v8 }
 0xcb2   : > { %4605 = vmatpush3.msra.mxu0 %v5231_v21 }
 0xcb3   : > { %4606 = vmatprep.subr.mxu0 %v4967_v8 }
 0xcb4   : > { %4607 = vmatpush3.msra.mxu0 %v5252_v31 }
 0xcb5   : > { %4608 = vmatprep.subr.mxu0 %v4967_v8 }
 0xcb6   : > { %4609 = vmatpush3.msra.mxu0 %v5259_v32 }
 0xcb7   : > { %4623 = vmatprep.subr.mxu0 %v4967_v8 }
 0xd5f   : > { %v2145_v13 = vpop.f32.mrf.mxu0 }
 0xd60   : > { %v2146_v14 = vadd.f32 %v4194_v12, %v2145_v13 }
 0xd61   : > { %v4585_v15 = vpop.f32.mrf.mxu0 }
 0xd62   : > { %4611 = vmatmul.mubr.msk.f32.vlgmr.msra.gmra.mxu0 %vm760_vm2, %v2146_v14  ;;  %v2149_v17 = vmul.f32 %v2146_v14, %v5272_v37 }
 0xd63   : > { %4625 = vmatprep.mubr.msk.f32.mxu0 %vm4968_vm1, %v4967_v8 }
 0xe22   : > { %v2219_v16 = vpop.f32.mrf.mxu0 }
 0xe23   : > { %v2223_v18 = vmul.f32 %v2219_v16, %v5277_v38 }
 0xe24   : > { %v4612_v19 = vpop.f32.mrf.mxu0 }
 0xe25   : > { %v5568_v20 = vadd.f32 %v2223_v18, %v2149_v17  ;;  %v4199_v18 = vld [vmem:[%s6002_s10 + $0x30] sm:$0xff] }
 0xe27   : > { %2398 = vrot.lane.b32.xlu0 %v5568_v20, %s6053_s3  ;;  %2231 = vrot.lane.b32.xlu1 %v5568_v20, %s6054_s25  ;;  %s6061_s3 = smov 48  }
 0xe2b   : > { %2396 = vrot.lane.b32.xlu1 %v5568_v20, %s6055_s21 }
 0xe99   : > { %v2399_v21 = vpop.permute.xlu0 %2398  ;;  %v2232_v31 = vpop.permute.xlu1 %2231 }
 0xe9a   : > { %4614 = vmatpush3.xpose.msk.msra.mxu1 %vm843_vm3, %v2232_v31  ;;  %4624 = vmatpush3.xpose.msk.msra.mxu0 %vm843_vm3, %v2399_v21 }
 0xe9b   : > { %4618 = vmatprep.subr.mxu1 %v4967_v8  ;;  %4633 = vmatprep.subr.mxu0 %v4967_v8 }
 0xe9d   : > { %4616 = vmatmul.mubr.msk.f32.vlgmr.msra.gmra.mxu1 %vm843_vm3, %v5568_v20  ;;  %v2397_v32 = vpop.permute.xlu1 %2396 }
 0xe9e   : > { %4626 = vmatmul.mubr.msk.f32.vlgmr.msra.gmra.mxu0 %vm843_vm3, %v2397_v32  ;;  %4620 = vmatprep.mubr.msk.f32.mxu1 %vm4968_vm1, %v4967_v8 }
 0xe9f   : > { %4635 = vmatprep.mubr.msk.f32.mxu0 %vm4968_vm1, %v4967_v8  ;;  %4634 = vmatpush3.msra.mxu0 %v4198_v48 }
 0xea0   : > { %4643 = vmatprep.subr.mxu0 %v4967_v8 }
 0xf5d   : > { %v2303_v37 = vpop.f32.mrf.mxu1 }
 0xf5e   : > { %v2307_v38 = vmul.f32 0.35355338, %v2303_v37  ;;  %v2470_v22 = vpop.f32.mrf.mxu0 }
 0xf5f   : > { %v2474_v23 = vmul.f32 0.35355338, %v2470_v22  ;;  %v4617_v24 = vpop.f32.mrf.mxu1 }
 0xf60   : > { %v4627_v25 = vpop.f32.mrf.mxu0  ;;  %v2308_v43 = vsel %vm5298_vm4, %v2307_v38, -3.4028235e+38 }
 0xf61   : > { %v2309_v26 = vsel %vm843_vm3, %v2308_v43, -inf  ;;  %v2475_v28 = vsel %vm5298_vm4, %v2474_v23, -3.4028235e+38 }
 0xf62   : > { %2310 = vmax.xlane.f32.xlu1 %v2309_v26  ;;  %v2476_v29 = vsel %vm843_vm3, %v2475_v28, -inf }
 0xf63   : > { %2477 = vmax.xlane.f32.xlu0 %v2476_v29  ;;  %v4226_v29 = vld [vmem:[%s6004_s12 + $0x38] sm:$0xff] }
 0xf73   : > { %2318 = vrot.lane.b32.xlu1 %v5568_v20, %s6056_s0  ;;  %s618_s0 = sand.u32 1, %s4957_s22  }
 0xf74   : > { %s4084_s21 = scalar_lea.sflag [#allocation3], %s618_s0 }
 0xf79   : > { %2485 = vrot.lane.b32.xlu0 %v5568_v20, %s6057_s26  ;;  %s4260_s26 = sshll.u32 %s5107_s2, 4  ;;  %s4980_s2 = smov [#allocation2]  }
 0xf7a   : > { %s5957_s25 = scalar_lea.hbm %s6012_s20, %s4260_s26 }
 0xf7d   : > { %2711 = vrot.lane.b32.xlu0 %v5568_v20, %s6058_s23  ;;  %s6062_s23 = smov 56  }
 0xf81   : > { %2709 = vrot.lane.b32.xlu0 %v5568_v20, %s6059_s30  ;;  %s6063_s30 = smov 40  }
 0xfeb   : > { %v2311_v30 = vpop.xlane.xlu1 %2310 }
 0xfec   : > { %v2312_v27 = vsub.f32 %v2308_v43, %v2311_v30  ;;  %v2478_v33 = vpop.xlane.xlu0 %2477 }
 0xfed   : > { %v2479_v34 = vsub.f32 %v2475_v28, %v2478_v33  ;;  %v4225_v33 = vld [vmem:[%s6004_s12 + $0x30] sm:$0xff] }
 0xfee   : > { %v2313_v36 = vmul.f32 1.442695, %v2312_v27  ;;  %v4221_v27 = vld [vmem:[%s6051_s6 + $0x1] ss:$0 sm:$0xff]  ;;  %s4909_s6 = sshll.u32 %s4980_s2, 4  ;;  %s4910_s6 = int_to_ptr.vmem [resolvable:$false] %s4909_s6 }
 0xfef   : > { %v2480_v39 = vmul.f32 1.442695, %v2479_v34  ;;  %v2319_v40 = vpop.permute.xlu1 %2318  ;;  %v4224_v34 = vld [vmem:[%s6004_s12 + $0x28] sm:$0xff] }
 0xff0   : > { %4883 = vpow2.f32 %v2313_v36  ;;  %4619 = vmatpush3.msra.mxu1 %v2319_v40  ;;  %v2486_v44 = vpop.permute.xlu0 %2485  ;;  %v3210_v36 = vmul.f32 %v4221_v27, %v5527_v7  ;;  %v4223_v40 = vld [vmem:[%s6004_s12 + $0x20] sm:$0xff] }
 0xff1   : > { %4885 = vpow2.f32 %v2480_v39  ;;  %4628 = vmatprep.subr.mxu1 %v4967_v8  ;;  %v4222_v39 = vld [vmem:[%s6052_s7 + $0x1] ss:$0 sm:$0xff]  ;;  %s4911_s7 = scalar_lea.vmem %s4910_s6, 32 }
 0xff4   : > { %v2712_v49 = vpop.permute.xlu0 %2711 }
 0xff8   : > { %v2710_v51 = vpop.permute.xlu0 %2709 }
 0xffd   : > { %v4884_v41 = vpop.eup %4883 }
 0xffe   : > { %v4886_v42 = vpop.eup %4885  ;;  %4621 = vmatmul.mubr.msk.f32.vlgmr.msra.gmra.mxu1 %vm843_vm3, %v4884_v41  ;;  %v2315_v46 = vsel %vm843_vm3, %v4884_v41, 0.0  ;;  %v3217_v41 = vadd.f32 %v4222_v39, %v3210_v36  ;;  %v4249_v39 = vld [vmem:[%s6007_s15 + $0x1] ss:$0 sm:$0xff] }
 0xfff   : > { %4629 = vmatpush3.msra.mxu1 %v2486_v44  ;;  %2316 = vadd.xlane.f32.xlu0 %v2315_v46  ;;  %v2482_v47 = vsel %vm843_vm3, %v4886_v42, 0.0  ;;  %v4200_v46 = vld [vmem:[%s6002_s10 + $0x38] sm:$0xff] }
0x1000   : > { %2483 = vadd.xlane.f32.xlu1 %v2482_v47  ;;  %4630 = vmatprep.mubr.msk.f32.mxu1 %vm4968_vm1, %v4967_v8 }
0x1001   : > { %4638 = vmatprep.subr.mxu1 %v4967_v8 }
0x1002   : > { %4631 = vmatmul.mubr.msk.f32.vlgmr.msra.gmra.mxu1 %vm843_vm3, %v4886_v42 }
0x1003   : > { %4640 = vmatprep.mubr.msk.f32.mxu1 %vm4968_vm1, %v4967_v8  ;;  %4639 = vmatpush3.msra.mxu1 %v4197_v45 }
0x1004   : > { %4648 = vmatprep.subr.mxu1 %v4967_v8 }
0x1011   : > { %2798 = vrot.lane.b32.xlu1 %v5568_v20, %s6060_s27 }
0x1015   : > { %2952 = vrot.lane.b32.xlu0 %v5568_v20, %s6061_s3 }
0x1088   : > { %v2317_v52 = vpop.xlane.xlu0 %2316 }
0x1089   : > { %4887 = vrcp.f32 %v2317_v52  ;;  %v2484_v53 = vpop.xlane.xlu1 %2483 }
0x108a   : > { %4889 = vrcp.f32 %v2484_v53  ;;  %v4246_v53 = vld [vmem:[%s6006_s14 + $0xf0] sm:$0xff] }
0x108c   : > { %v2953_v15 = vpop.permute.xlu0 %2952 }
0x108d   : > { %v2799_v58 = vpop.permute.xlu1 %2798 }
0x1096   : > { %v4888_v54 = vpop.eup %4887 }
0x1097   : > { %v4890_v59 = vpop.eup %4889 }
0x10be   : > { %v2390_v55 = vpop.f32.mrf.mxu1 }
0x10bf   : > { %v2395_v57 = vmul.f32 %v4888_v54, %v2390_v55  ;;  %v4245_v54 = vld [vmem:[%s6006_s14 + $0xe8] sm:$0xff]  ;;  %v4228_v55 = vld [vmem:[%s6005_s13 + $0x1] ss:$0 sm:$0xff] }
0x10c0   : > { %v4622_v35 = vpop.f32.mrf.mxu1 }
0x10c1   : > { %4641 = vmatmul.mubr.msk.f32.vlgmr.msra.gmra.mxu1 %vm843_vm3, %v2395_v57  ;;  %v4244_v57 = vld [vmem:[%s6006_s14 + $0xe0] sm:$0xff] }
0x10c2   : > { %4649 = vmatpush3.msra.mxu1 %v2799_v58  ;;  %v2557_v60 = vpop.f32.mrf.mxu1  ;;  %4650 = vmatprep.mubr.msk.f32.mxu1 %vm4968_vm1, %v4967_v8 }
0x10c3   : > { %v2562_v61 = vmul.f32 %v4890_v59, %v2557_v60  ;;  %4658 = vmatprep.subr.mxu1 %v4967_v8  ;;  %v4243_v59 = vld [vmem:[%s6006_s14 + $0xd8] sm:$0xff] }
0x10c4   : > { %v4632_v62 = vpop.f32.mrf.mxu1 }
0x10c5   : > { %4636 = vmatmul.mubr.msk.f32.vlgmr.msra.gmra.mxu0 %vm843_vm3, %v2562_v61  ;;  %v4242_v62 = vld [vmem:[%s6006_s14 + $0xd0] sm:$0xff] }
0x10c6   : > { %4644 = vmatpush3.xpose.msk.msra.mxu0 %vm843_vm3, %v2712_v49  ;;  %4645 = vmatprep.mubr.msk.f32.mxu0 %vm4968_vm1, %v4967_v8 }
0x10c7   : > { %4653 = vmatprep.subr.mxu0 %v4967_v8 }
0x10c9   : > { %4646 = vmatmul.mubr.msk.f32.vlgmr.msra.gmra.mxu0 %vm843_vm3, %v2710_v51  ;;  %v4247_v51 = vld [vmem:[%s6006_s14 + $0xf8] sm:$0xff] }
0x10ca   : > { %4655 = vmatprep.mubr.msk.f32.mxu0 %vm4968_vm1, %v4967_v8  ;;  %4654 = vmatpush3.msra.mxu0 %v4199_v18 }
0x10cb   : > { %4663 = vmatprep.subr.mxu0 %v4967_v8 }
0x1181   : > { %v2705_v0 = vpop.f32.mrf.mxu1 }
0x1183   : > { %v4642_v63 = vpop.f32.mrf.mxu1 }
0x1184   : > { %v4241_v63 = vld [vmem:[%s6006_s14 + $0xc8] sm:$0xff] }
0x1185   : > { %v2632_v1 = vpop.f32.mrf.mxu0 }
0x1186   : > { %v5635_v2 = vadd.f32 %v2705_v0, %v2632_v1 }
0x1187   : > { %v4637_v3 = vpop.f32.mrf.mxu0 }
0x1189   : > { %v2783_v4 = vpop.f32.mrf.mxu0 }
0x118a   : > { %v2787_v5 = vmul.f32 0.35355338, %v2783_v4  ;;  %v4239_v4 = vld [vmem:[%s6006_s14 + $0xb8] sm:$0xff] }
0x118b   : > { %v4647_v6 = vpop.f32.mrf.mxu0 }
0x118c   : > { %v2788_v9 = vsel %vm5298_vm4, %v2787_v5, -3.4028235e+38  ;;  %v4238_v5 = vld [vmem:[%s6006_s14 + $0xb0] sm:$0xff]  ;;  %v4237_v6 = vld [vmem:[%s6006_s14 + $0xa8] sm:$0xff] }
0x118d   : > { %v2789_v10 = vsel %vm843_vm3, %v2788_v9, -inf }
0x118e   : > { %2790 = vmax.xlane.f32.xlu1 %v2789_v10 }
0x119f   : > { %2950 = vrot.lane.b32.xlu1 %v5568_v20, %s6062_s23  ;;  %s619_s23 = scalar_lea.vmem [#allocation2], %s618_s0 }
0x1217   : > { %v2791_v11 = vpop.xlane.xlu1 %2790 }
0x1218   : > { %v2792_v12 = vsub.f32 %v2788_v9, %v2791_v11  ;;  %v4236_v9 = vld [vmem:[%s6006_s14 + $0xa0] sm:$0xff]  ;;  %v4235_v11 = vld [vmem:[%s6006_s14 + $0x98] sm:$0xff] }
0x121a   : > { %v2793_v13 = vmul.f32 1.442695, %v2792_v12  ;;  %v4234_v12 = vld [vmem:[%s6006_s14 + $0x90] sm:$0xff] }
0x121b   : > { %v2951_v17 = vpop.permute.xlu1 %2950 }
0x121c   : > { %4891 = vpow2.f32 %v2793_v13 }
0x1229   : > { %v4892_v14 = vpop.eup %4891 }
0x122a   : > { %4651 = vmatmul.mubr.msk.f32.vlgmr.msra.gmra.mxu1 %vm843_vm3, %v4892_v14  ;;  %v2795_v16 = vsel %vm843_vm3, %v4892_v14, 0.0  ;;  %v4233_v14 = vld [vmem:[%s6006_s14 + $0x88] sm:$0xff] }
0x122b   : > { %4659 = vmatpush3.xpose.msk.msra.mxu1 %vm843_vm3, %v2953_v15  ;;  %2796 = vadd.xlane.f32.xlu1 %v2795_v16  ;;  %v4232_v15 = vld [vmem:[%s6006_s14 + $0x80] sm:$0xff] }
0x122c   : > { %4660 = vmatprep.mubr.msk.f32.mxu1 %vm4968_vm1, %v4967_v8  ;;  %4668 = vmatprep.subr.mxu1 %v4967_v8 }
0x122e   : > { %4661 = vmatmul.mubr.msk.f32.vlgmr.msra.gmra.mxu1 %vm843_vm3, %v2951_v17 }
0x122f   : > { %4670 = vmatprep.mubr.msk.f32.mxu1 %vm4968_vm1, %v4967_v8  ;;  %4669 = vmatpush3.msra.mxu1 %v4200_v46 }
0x1230   : > { %4684 = vmatprep.subr.mxu1 %v4967_v8 }
0x123c   : > { %3039 = vrot.lane.b32.xlu1 %v5568_v20, %s6063_s30  ;;  %s4096_s30 = sshll.u32 %s619_s23, 4  ;;  %s4097_s30 = int_to_ptr.vmem [resolvable:$true] %s4096_s30 }
0x123d   : > { %s4905_s5 = scalar_lea.vmem %s4097_s30, 16  ;;  %p4912_p0 = scmp.lt.s32.totalorder %s4097_s30, %s4910_s6 }
0x123e   : > { %p4906_p11 = scmp.ne.s32.totalorder %s4097_s30, %s4905_s5  ;;  %p4913_p1 = scmp.lt.s32.totalorder %s4911_s7, %s4905_s5 }
0x1240   : > { %p4907_p12 = pnand %p4906_p11, %p5124_p5  ;;  %p4914_p2 = por %p4913_p1, %p4912_p0 }
0x1242   : > { %p4908_p13 = pneg %p4907_p12 }
0x1244   : > { %p4915_p3 = pnand %p4914_p2, %p4908_p13 }
0x12b4   : > { %v2797_v19 = vpop.xlane.xlu1 %2796 }
0x12b5   : > { %4893 = vrcp.f32 %v2797_v19 }
0x12b8   : > { %v3040_v38 = vpop.permute.xlu1 %3039 }
0x12c2   : > { %v4894_v21 = vpop.eup %4893 }
0x12ea   : > { %v2870_v31 = vpop.f32.mrf.mxu1 }
0x12eb   : > { %v2875_v32 = vmul.f32 %v4894_v21, %v2870_v31 }
0x12ec   : > { %v4652_v37 = vpop.f32.mrf.mxu1 }
0x12ed   : > { %4656 = vmatmul.mubr.msk.f32.vlgmr.msra.gmra.mxu0 %vm843_vm3, %v2875_v32 }
0x12ee   : > { %4664 = vmatpush3.msra.mxu0 %v3040_v38  ;;  %v3024_v22 = vpop.f32.mrf.mxu1  ;;  %4665 = vmatprep.mubr.msk.f32.mxu0 %vm4968_vm1, %v4967_v8 }
0x12ef   : > { %v3028_v20 = vmul.f32 0.35355338, %v3024_v22  ;;  %4673 = vmatprep.subr.mxu0 %v4967_v8 }
0x12f0   : > { %v4662_v23 = vpop.f32.mrf.mxu1 }
0x12f1   : > { %v3029_v24 = vsel %vm5298_vm4, %v3028_v20, -3.4028235e+38 }
0x12f2   : > { %v3030_v25 = vsel %vm843_vm3, %v3029_v24, -inf }
0x12f3   : > { %3031 = vmax.xlane.f32.xlu0 %v3030_v25 }
0x137c   : > { %v3032_v43 = vpop.xlane.xlu0 %3031 }
0x137d   : > { %v3033_v26 = vsub.f32 %v3029_v24, %v3032_v43 }
0x137f   : > { %v3034_v28 = vmul.f32 1.442695, %v3033_v26 }
0x1381   : > { %4895 = vpow2.f32 %v3034_v28 }
0x138e   : > { %v4896_v30 = vpop.eup %4895 }
0x138f   : > { %4666 = vmatmul.mubr.msk.f32.vlgmr.msra.gmra.mxu0 %vm843_vm3, %v4896_v30  ;;  %v3036_v50 = vsel %vm843_vm3, %v4896_v30, 0.0 }
0x1390   : > { %4674 = vmatpush3.msra.mxu0 %v4226_v29  ;;  %3037 = vadd.xlane.f32.xlu0 %v3036_v50 }
0x1391   : > { %4675 = vmatprep.subr.mxu0 %v4967_v8  ;;  %4681 = vmatprep.mubr.msk.f32.mxu0 %vm4968_vm1, %v4967_v8 }
0x1392   : > { %4676 = vmatpush3.msra.mxu0 %v4225_v33 }
0x1393   : > { %4677 = vmatprep.subr.mxu0 %v4967_v8 }
0x1394   : > { %4678 = vmatpush3.msra.mxu0 %v4224_v34  ;;  %v4218_v34 = vld [vmem:[%s6003_s11 + $0x1] ss:$0 sm:$0xff] }
0x1395   : > { %4679 = vmatprep.subr.mxu0 %v4967_v8 }
0x1396   : > { %4680 = vmatpush3.msra.mxu0 %v4223_v40 }
0x1397   : > { %4682 = vmatmul.mubr.msk.f32.vlgmr.msra.gmra.mxu0 %vm646_vm0, %v3217_v41  ;;  %4719 = vmatprep.subr.mxu0 %v4967_v8 }
0x1398   : > { %4727 = vmatprep.mubr.msk.f32.mxu0 %vm4968_vm1, %v4967_v8 }
0x13ad   : > { %v2945_v7 = vpop.f32.mrf.mxu0 }
0x13ae   : > { %v5695_v42 = vadd.f32 %v2945_v7, %v5635_v2  ;;  %v4240_v2 = vld [vmem:[%s6006_s14 + $0xc0] sm:$0xff] }
0x13af   : > { %v4657_v44 = vpop.f32.mrf.mxu0 }
0x1419   : > { %v3038_v47 = vpop.xlane.xlu0 %3037 }
0x141a   : > { %4897 = vrcp.f32 %v3038_v47 }
0x1427   : > { %v4898_v45 = vpop.eup %4897 }
0x144f   : > { %v3111_v48 = vpop.f32.mrf.mxu0 }
0x1450   : > { %v3116_v49 = vmul.f32 %v4898_v45, %v3111_v48 }
0x1451   : > { %v4667_v52 = vpop.f32.mrf.mxu0 }
0x1452   : > { %4671 = vmatmul.mubr.msk.f32.vlgmr.msra.gmra.mxu1 %vm843_vm3, %v3116_v49  ;;  %v3461_v52 = vld [vmem:[%s6010_s18 + $0x18] sm:$0xff] }
0x1453   : > { %4685 = vmatpush3.msra.mxu1 %v4247_v51  ;;  %4716 = vmatprep.mubr.msk.f32.mxu1 %vm4968_vm1, %v4967_v8 }
0x1454   : > { %4686 = vmatprep.subr.mxu1 %v4967_v8  ;;  %4720 = vmatpush3.msra.mxu0 %v3461_v52 }
0x1455   : > { %4687 = vmatpush3.msra.mxu1 %v4246_v53  ;;  %4721 = vmatprep.subr.mxu0 %v4967_v8  ;;  %v3773_v53 = vld [vmem:[%s6010_s18 + $0x98] sm:$0xff] }
0x1456   : > { %4688 = vmatprep.subr.mxu1 %v4967_v8 }
0x1457   : > { %v3300_v35 = vpop.f32.mrf.mxu0  ;;  %4689 = vmatpush3.msra.mxu1 %v4245_v54  ;;  %v3459_v54 = vld [vmem:[%s6010_s18 + $0x8] sm:$0xff] }
0x1458   : > { %v5721_v58 = vadd.f32 %v4228_v55, %v3300_v35  ;;  %4690 = vmatprep.subr.mxu1 %v4967_v8  ;;  %v3772_v55 = vld [vmem:[%s6010_s18 + $0x90] sm:$0xff]  ;;  %v3771_v35 = vld [vmem:[%s6010_s18 + $0x88] sm:$0xff] }
0x1459   : > { %v4683_v60 = vpop.f32.mrf.mxu0  ;;  %4691 = vmatpush3.msra.mxu1 %v4244_v57  ;;  %v3458_v57 = vld [vmem:[%s6010_s18] sm:$0xff] }
0x145a   : > { %v3305_v61 = vmul.f32 0.70710677, %v5721_v58  ;;  %4692 = vmatprep.subr.mxu1 %v4967_v8  ;;  %v3304_v28 = vmul.f32 0.5, %v5721_v58  ;;  %v3770_v58 = vld [vmem:[%s6010_s18 + $0x80] sm:$0xff] }
0x145b   : > { %4693 = vmatpush3.msra.mxu1 %v4243_v59 }
0x145c   : > { %v3306_v0 = vand.u32 2147483647, %v3305_v61  ;;  %4694 = vmatprep.subr.mxu1 %v4967_v8  ;;  %vm3326_vm6 = vcmp.lt.f32.partialorder %v3305_v61, 0.0 }
0x145d   : > { %4695 = vmatpush3.msra.mxu1 %v4242_v62 }
0x145e   : > { %v3307_v1 = vmul.f32 0.3275911, %v3306_v0  ;;  %4696 = vmatprep.subr.mxu1 %v4967_v8  ;;  %v3320_v10 = vsub.f32 0.0, %v3306_v0 }
0x145f   : > { %4697 = vmatpush3.msra.mxu1 %v4241_v63 }
0x1460   : > { %v3308_v3 = vadd.f32 1.0, %v3307_v1  ;;  %4698 = vmatprep.subr.mxu1 %v4967_v8  ;;  %v3321_v13 = vmul.f32 %v3320_v10, %v3306_v0  ;;  %v4250_v0 = vld [vmem:[%s6008_s16] ss:$0 sm:$0xff]  ;;  %v3537_v10 = vld [vmem:[%s6010_s18 + $0x28] sm:$0xff] }
0x1461   : > { %4699 = vmatpush3.msra.mxu1 %v4240_v2  ;;  %v4251_v1 = vld [vmem:[%s6009_s17] ss:$0 sm:$0xff] }
0x1462   : > { %4899 = vrcp.f32 %v3308_v3  ;;  %4700 = vmatprep.subr.mxu1 %v4967_v8  ;;  %v3322_v18 = vmul.f32 1.442695, %v3321_v13  ;;  %v3927_v13 = vld [vmem:[%s6010_s18 + $0xc8] sm:$0xff] }
0x1463   : > { %4701 = vmatpush3.msra.mxu1 %v4239_v4  ;;  %v3539_v4 = vld [vmem:[%s6010_s18 + $0x38] sm:$0xff] }
0x1464   : > { %4702 = vmatprep.subr.mxu1 %v4967_v8  ;;  %4901 = vpow2.f32 %v3322_v18  ;;  %v3616_v18 = vld [vmem:[%s6010_s18 + $0x50] sm:$0xff] }
0x1465   : > { %4703 = vmatpush3.msra.mxu1 %v4238_v5  ;;  %v3538_v5 = vld [vmem:[%s6010_s18 + $0x30] sm:$0xff] }
0x1466   : > { %4704 = vmatprep.subr.mxu1 %v4967_v8 }
0x1467   : > { %4705 = vmatpush3.msra.mxu1 %v4237_v6 }
0x1468   : > { %4706 = vmatprep.subr.mxu1 %v4967_v8 }
0x1469   : > { %4707 = vmatpush3.msra.mxu1 %v4236_v9  ;;  %v3929_v9 = vld [vmem:[%s6010_s18 + $0xd8] sm:$0xff] }
0x146a   : > { %4708 = vmatprep.subr.mxu1 %v4967_v8 }
0x146b   : > { %4709 = vmatpush3.msra.mxu1 %v4235_v11  ;;  %v3928_v11 = vld [vmem:[%s6010_s18 + $0xd0] sm:$0xff] }
0x146c   : > { %4710 = vmatprep.subr.mxu1 %v4967_v8 }
0x146d   : > { %4711 = vmatpush3.msra.mxu1 %v4234_v12  ;;  %v3536_v12 = vld [vmem:[%s6010_s18 + $0x20] sm:$0xff] }
0x146e   : > { %4712 = vmatprep.subr.mxu1 %v4967_v8 }
0x146f   : > { %v4900_v16 = vpop.eup %4899  ;;  %4713 = vmatpush3.msra.mxu1 %v4233_v14 }
0x1470   : > { %v3311_v17 = vmul.f32 1.0614054, %v4900_v16  ;;  %4714 = vmatprep.subr.mxu1 %v4967_v8 }
0x1471   : > { %4715 = vmatpush3.msra.mxu1 %v4232_v15  ;;  %v4902_v23 = vpop.eup %4901  ;;  %v3617_v15 = vld [vmem:[%s6010_s18 + $0x58] sm:$0xff] }
0x1472   : > { %v4230_v19 = vadd.f32 -1.4531521, %v3311_v17  ;;  %4763 = vmatprep.subr.mxu1 %v4967_v8 }
0x1474   : > { %v3313_v21 = vmul.f32 %v4900_v16, %v4230_v19  ;;  %v3615_v19 = vld [vmem:[%s6010_s18 + $0x48] sm:$0xff] }
0x1476   : > { %v3314_v31 = vadd.f32 1.4214138, %v3313_v21  ;;  %v3614_v21 = vld [vmem:[%s6010_s18 + $0x40] sm:$0xff] }
0x1478   : > { %v3315_v32 = vmul.f32 %v4900_v16, %v3314_v31 }
0x147a   : > { %v4231_v37 = vadd.f32 -0.28449672, %v3315_v32  ;;  %v3695_v32 = vld [vmem:[%s6010_s18 + $0x78] sm:$0xff] }
0x147c   : > { %v3317_v38 = vmul.f32 %v4900_v16, %v4231_v37  ;;  %v3694_v37 = vld [vmem:[%s6010_s18 + $0x70] sm:$0xff] }
0x147e   : > { %v3318_v22 = vadd.f32 0.2548296, %v3317_v38  ;;  %v3693_v38 = vld [vmem:[%s6010_s18 + $0x68] sm:$0xff] }
0x1480   : > { %v3319_v20 = vmul.f32 %v4900_v16, %v3318_v22  ;;  %v3926_v16 = vld [vmem:[%s6010_s18 + $0xc0] sm:$0xff] }
0x1481   : > { %v3692_v22 = vld [vmem:[%s6010_s18 + $0x60] sm:$0xff] }
0x1482   : > { %v3324_v24 = vmul.f32 %v4902_v23, %v3319_v20  ;;  %v3851_v23 = vld [vmem:[%s6010_s18 + $0xb8] sm:$0xff] }
0x1484   : > { %v3325_v25 = vsub.f32 1.0, %v3324_v24  ;;  %v3850_v24 = vld [vmem:[%s6010_s18 + $0xb0] sm:$0xff] }
0x1486   : > { %v3327_v43 = vsub.f32 0.0, %v3325_v25 }
0x1488   : > { %v3328_v26 = vsel %vm3326_vm6, %v3327_v43, %v3325_v25  ;;  %v3849_v25 = vld [vmem:[%s6010_s18 + $0xa8] sm:$0xff]  ;;  %v3848_v43 = vld [vmem:[%s6010_s18 + $0xa0] sm:$0xff] }
0x1489   : > { %v3329_v29 = vadd.f32 1.0, %v3328_v26 }
0x148b   : > { %v3330_v30 = vmul.f32 %v3329_v29, %v3304_v28  ;;  %v4007_v28 = vld [vmem:[%s6010_s18 + $0xf8] sm:$0xff]  ;;  %v4006_v29 = vld [vmem:[%s6010_s18 + $0xf0] sm:$0xff] }
0x148d   : > { %4717 = vmatmul.mubr.f32.vlgmr.msra.gmra.mxu1 %v3330_v30  ;;  %v4005_v30 = vld [vmem:[%s6010_s18 + $0xe8] sm:$0xff] }
0x148e   : > { %4771 = vmatprep.mubr.msk.f32.mxu1 %vm4968_vm1, %v4967_v8  ;;  %4764 = vmatpush3.msra.mxu1 %v3773_v53 }
0x148f   : > { %4765 = vmatprep.subr.mxu1 %v4967_v8 }
0x1490   : > { %4766 = vmatpush3.msra.mxu1 %v3772_v55 }
0x1491   : > { %4767 = vmatprep.subr.mxu1 %v4967_v8 }
0x1492   : > { %4768 = vmatpush3.msra.mxu1 %v3771_v35 }
0x1493   : > { %4769 = vmatprep.subr.mxu1 %v4967_v8 }
0x1494   : > { %4770 = vmatpush3.msra.mxu1 %v3770_v58 }
0x1495   : > { %4785 = vmatprep.subr.mxu1 %v4967_v8 }
0x1512   : > { %v3186_v27 = vpop.f32.mrf.mxu1 }
0x1513   : > { %v3190_v33 = vadd.f32 %v3186_v27, %v5695_v42  ;;  %v4004_v27 = vld [vmem:[%s6010_s18 + $0xe0] sm:$0xff] }
0x1514   : > { %v4672_v50 = vpop.f32.mrf.mxu1 }
0x1515   : > { %v3199_v36 = vadd.f32 %v4218_v34, %v3190_v33 }
0x1517   : > { %v3426_v7 = vadd.f32 %v3199_v36, %v5502_v56  ;;  %v3460_v56 = vld [vmem:[%s6010_s18 + $0x10] sm:$0xff] }
0x1518   : > { %4722 = vmatpush3.msra.mxu0 %v3460_v56 }
0x1519   : > { %4723 = vmatprep.subr.mxu0 %v4967_v8 }
0x151a   : > { %4724 = vmatpush3.msra.mxu0 %v3459_v54 }
0x151b   : > { %4725 = vmatprep.subr.mxu0 %v4967_v8 }
0x151c   : > { %4726 = vmatpush3.msra.mxu0 %v3458_v57 }
0x151d   : > { %4730 = vmatprep.subr.mxu0 %v4967_v8 }
0x154d   : > { %v3422_v40 = vpop.f32.mrf.mxu1 }
0x154e   : > { %v3423_v41 = vadd.f32 %v4249_v39, %v3422_v40 }
0x154f   : > { %v4718_v44 = vpop.f32.mrf.mxu1 }
0x1550   : > { %v3427_v46 = vadd.f32 %v3426_v7, %v3423_v41 }
0x1552   : > { %v3430_v47 = vsel %vm646_vm0, %v3427_v46, 0.0 }
0x1553   : > { %3431 = vadd.xlane.f32.xlu0 %v3430_v47 }
0x15dc   : > { %v3432_v45 = vpop.xlane.xlu0 %3431 }
0x15dd   : > { %v3433_v42 = vmul.f32 0.03125, %v3432_v45 }
0x15df   : > { %v3434_v48 = vsub.f32 %v3427_v46, %v3433_v42 }
0x15e1   : > { %v3435_v49 = vmul.f32 %v3434_v48, %v3434_v48 }
0x15e3   : > { %v3436_v51 = vsel %vm646_vm0, %v3435_v49, 0.0 }
0x15e4   : > { %3437 = vadd.xlane.f32.xlu1 %v3436_v51 }
0x166d   : > { %v3438_v59 = vpop.xlane.xlu1 %3437 }
0x166e   : > { %v3439_v60 = vmul.f32 0.03125, %v3438_v59 }
0x1670   : > { %v3440_v61 = vadd.f32 1e-05, %v3439_v60 }
0x1672   : > { %4903 = vrsqrt.f32 %v3440_v61 }
0x167f   : > { %v4904_v62 = vpop.eup %4903 }
0x1680   : > { %v3442_v63 = vmul.f32 %v4904_v62, %v3434_v48 }
0x1682   : > { %v3449_v2 = vmul.f32 %v4250_v0, %v3442_v63 }
0x1684   : > { %v5825_v3 = vadd.f32 %v4251_v1, %v3449_v2 }
0x1686   : > { %4728 = vmatmul.mubr.msk.f32.vlgmr.msra.gmra.mxu0 %vm646_vm0, %v5825_v3  ;;  %v3774_v6 = vrot.slane %v5825_v3, 4  ;;  %v3540_v14 = vrot.slane %v5825_v3, 1  ;;  %v3930_v17 = vrot.slane %v5825_v3, 6  ;;  %v3618_v31 = vrot.slane %v5825_v3, 2 }
0x1687   : > { %4731 = vmatpush3.msra.mxu0 %v3539_v4  ;;  %4738 = vmatprep.mubr.msk.f32.mxu0 %vm4968_vm1, %v4967_v8  ;;  %v3696_v20 = vrot.slane %v5825_v3, 3  ;;  %v3852_v26 = vrot.slane %v5825_v3, 5  ;;  %v4008_v50 = vrot.slane %v5825_v3, 7 }
0x1688   : > { %4732 = vmatprep.subr.mxu0 %v4967_v8  ;;  %4772 = vmatmul.mubr.msk.f32.vlgmr.msra.gmra.mxu1 %vm646_vm0, %v3774_v6 }
0x1689   : > { %4733 = vmatpush3.msra.mxu0 %v3538_v5  ;;  %4786 = vmatpush3.msra.mxu1 %v3929_v9 }
0x168a   : > { %4734 = vmatprep.subr.mxu0 %v4967_v8  ;;  %4787 = vmatprep.subr.mxu1 %v4967_v8 }
0x168b   : > { %4735 = vmatpush3.msra.mxu0 %v3537_v10  ;;  %4788 = vmatpush3.msra.mxu1 %v3928_v11 }
0x168c   : > { %4736 = vmatprep.subr.mxu0 %v4967_v8  ;;  %4789 = vmatprep.subr.mxu1 %v4967_v8 }
0x168d   : > { %4737 = vmatpush3.msra.mxu0 %v3536_v12  ;;  %4790 = vmatpush3.msra.mxu1 %v3927_v13 }
0x168e   : > { %4739 = vmatmul.mubr.msk.f32.vlgmr.msra.gmra.mxu0 %vm646_vm0, %v3540_v14  ;;  %4741 = vmatprep.subr.mxu0 %v4967_v8 }
0x168f   : > { %4791 = vmatprep.subr.mxu1 %v4967_v8  ;;  %4742 = vmatpush3.msra.mxu0 %v3617_v15 }
0x1690   : > { %4792 = vmatpush3.msra.mxu1 %v3926_v16  ;;  %4793 = vmatprep.mubr.msk.f32.mxu1 %vm4968_vm1, %v4967_v8 }
0x1691   : > { %4743 = vmatprep.subr.mxu0 %v4967_v8  ;;  %4794 = vmatmul.mubr.msk.f32.vlgmr.msra.gmra.mxu1 %vm646_vm0, %v3930_v17 }
0x1692   : > { %4744 = vmatpush3.msra.mxu0 %v3616_v18  ;;  %4749 = vmatprep.mubr.msk.f32.mxu0 %vm4968_vm1, %v4967_v8 }
0x1693   : > { %4745 = vmatprep.subr.mxu0 %v4967_v8 }
0x1694   : > { %4746 = vmatpush3.msra.mxu0 %v3615_v19 }
0x1695   : > { %4747 = vmatprep.subr.mxu0 %v4967_v8 }
0x1696   : > { %4748 = vmatpush3.msra.mxu0 %v3614_v21 }
0x1697   : > { %4750 = vmatmul.mubr.msk.f32.vlgmr.msra.gmra.mxu0 %vm646_vm0, %v3618_v31  ;;  %4752 = vmatprep.subr.mxu0 %v4967_v8 }
0x1698   : > { %4753 = vmatpush3.msra.mxu0 %v3695_v32  ;;  %4760 = vmatprep.mubr.msk.f32.mxu0 %vm4968_vm1, %v4967_v8 }
0x1699   : > { %4754 = vmatprep.subr.mxu0 %v4967_v8 }
0x169a   : > { %4755 = vmatpush3.msra.mxu0 %v3694_v37 }
0x169b   : > { %4756 = vmatprep.subr.mxu0 %v4967_v8 }
0x169c   : > { %4757 = vmatpush3.msra.mxu0 %v3693_v38 }
0x169d   : > { %4758 = vmatprep.subr.mxu0 %v4967_v8 }
0x169e   : > { %4759 = vmatpush3.msra.mxu0 %v3692_v22 }
0x169f   : > { %4761 = vmatmul.mubr.msk.f32.vlgmr.msra.gmra.mxu0 %vm646_vm0, %v3696_v20  ;;  %4774 = vmatprep.subr.mxu0 %v4967_v8 }
0x16a0   : > { %4775 = vmatpush3.msra.mxu0 %v3851_v23  ;;  %4782 = vmatprep.mubr.msk.f32.mxu0 %vm4968_vm1, %v4967_v8 }
0x16a1   : > { %4776 = vmatprep.subr.mxu0 %v4967_v8 }
0x16a2   : > { %4777 = vmatpush3.msra.mxu0 %v3850_v24 }
0x16a3   : > { %4778 = vmatprep.subr.mxu0 %v4967_v8 }
0x16a4   : > { %4779 = vmatpush3.msra.mxu0 %v3849_v25 }
0x16a5   : > { %4780 = vmatprep.subr.mxu0 %v4967_v8 }
0x16a6   : > { %4781 = vmatpush3.msra.mxu0 %v3848_v43 }
0x16a7   : > { %4783 = vmatmul.mubr.msk.f32.vlgmr.msra.gmra.mxu0 %vm646_vm0, %v3852_v26  ;;  %4796 = vmatprep.subr.mxu0 %v4967_v8 }
0x16a8   : > { %4797 = vmatpush3.msra.mxu0 %v4007_v28  ;;  %4804 = vmatprep.mubr.msk.f32.mxu0 %vm4968_vm1, %v4967_v8 }
0x16a9   : > { %4798 = vmatprep.subr.mxu0 %v4967_v8 }
0x16aa   : > { %4799 = vmatpush3.msra.mxu0 %v4006_v29 }
0x16ab   : > { %4800 = vmatprep.subr.mxu0 %v4967_v8 }
0x16ac   : > { %4801 = vmatpush3.msra.mxu0 %v4005_v30 }
0x16ad   : > { %4802 = vmatprep.subr.mxu0 %v4967_v8  ;;  %v3457_v8 = vld [vmem:[%s6011_s19] sm:$0x1] }
0x16ae   : > { %4803 = vmatpush3.msra.mxu0 %v4004_v27 }
0x16af   : > { %4805 = vmatmul.mubr.msk.f32.vlgmr.msra.gmra.mxu0 %vm646_vm0, %v4008_v50 }
0x1746   : > { %v3531_v33 = vpop.f32.mrf.mxu0 }
0x1747   : > { %v3535_v45 = vadd.f32 %v3531_v33, %v3457_v8 }
0x1748   : > { %v4729_v34 = vpop.f32.mrf.mxu0  ;;  %v3843_v36 = vpop.f32.mrf.mxu1 }
0x174a   : > { %v4773_v39 = vpop.f32.mrf.mxu1 }
0x174e   : > { %v3609_v40 = vpop.f32.mrf.mxu0 }
0x174f   : > { %v3613_v48 = vadd.f32 %v3609_v40, %v3535_v45 }
0x1750   : > { %v4740_v41 = vpop.f32.mrf.mxu0 }
0x1751   : > { %v3999_v7 = vpop.f32.mrf.mxu1 }
0x1753   : > { %v4795_v44 = vpop.f32.mrf.mxu1 }
0x1757   : > { %v3687_v46 = vpop.f32.mrf.mxu0 }
0x1758   : > { %v3691_v51 = vadd.f32 %v3687_v46, %v3613_v48 }
0x1759   : > { %v4751_v47 = vpop.f32.mrf.mxu0 }
0x175f   : > { %v3765_v42 = vpop.f32.mrf.mxu0 }
0x1760   : > { %v3769_v52 = vadd.f32 %v3765_v42, %v3691_v51 }
0x1761   : > { %v4762_v49 = vpop.f32.mrf.mxu0 }
0x1762   : > { %v3847_v53 = vadd.f32 %v3843_v36, %v3769_v52 }
0x1767   : > { %v3921_v56 = vpop.f32.mrf.mxu0 }
0x1768   : > { %v3925_v55 = vadd.f32 %v3921_v56, %v3847_v53 }
0x1769   : > { %v4784_v54 = vpop.f32.mrf.mxu0 }
0x176a   : > { %v4003_v57 = vadd.f32 %v3999_v7, %v3925_v55 }
0x176f   : > { %v4077_v35 = vpop.f32.mrf.mxu0 }
0x1770   : > { %v4081_v58 = vadd.f32 %v4077_v35, %v4003_v57 }
0x1771   : > { %v4806_v59 = vpop.f32.mrf.mxu0 }
0x1772   : > { %4082 = vst [vmem:[%s619_s23] sm:$0x1] %v4081_v58 }
0x1773   : > { %4918 = shalt.err (!%p4915_p3)
}
0x1774   : > { %s4919_s26 = scalar_lea.hbm %s5957_s25, 16  ;;  %s4923_s27 = scalar_lea.hbm %s6012_s20, 32 }
0x1775   : > { %p4920_p4 = scmp.ne.s32.totalorder %s5957_s25, %s4919_s26  ;;  %p4924_p9 = scmp.lt.s32.totalorder %s5957_s25, %s6012_s20 }
0x1776   : > { %p4925_p10 = scmp.lt.s32.totalorder %s4923_s27, %s4919_s26 }
0x1777   : > { %p4921_p7 = pnand %p4920_p4, %p5124_p5 }
0x1778   : > { %p4926_p11 = por %p4925_p10, %p4924_p9 }
0x1779   : > { %p4922_p8 = pneg %p4921_p7 }
0x177b   : > { %p4927_p12 = pnand %p4926_p11, %p4922_p8 }
0x177d   : > { %4930 = shalt.err (!%p4927_p12)
}
0x177e   : > { %4807 = dma.vmem_to_hbm [thread:$0]  (%p5124_p5), %s4097_s30, 16, %s5957_s25, %s4084_s21  }
0x177f PF: > { %p4813_p13 = scmp.ge.s32.totalorder %s4965_s24, 2  ;;  %s4108_s5 = sand.u32 1, %s4953_s1  }
0x1780   : > { %s4109_s6 = scalar_lea.sflag [#allocation3], %s4108_s5 }
0x1781   : > { %p4810_p0 = pnand %p4813_p13, %p5128_p6 }
0x1783   : > { %p4811_p1 = pneg %p4810_p0 }
0x1785   : > { %4948 = dma.done.wait (%p4811_p1), %s4109_s6, 16  }
0x1786   : > { %4950 = vsyncadd (%p4811_p1), %s4109_s6, 4294967280  ;;  %s6064_s24 = sld [smem:[#allocation6_spill]]  ;;  %s6067_s1 = smov %s4957_s22 }
0x1787   : > { %s6065_s7 = sld [smem:[#allocation5_spill]] }
0x1788   : > { %s6066_s23 = sld [smem:[#allocation7_spill]] }
0x178c   : > { %p30_p2 = scmp.ge.s32.totalorder %s6064_s24, 4  }
0x178d   : > { %s6068_s22 = smov %s6065_s7 }
0x178e   :  { %32 = sbr.rel (!%p30_p2) target bundleno = 12 (0xc), region = 147 }
0x1793   :  { %4113 = vsyncpa [#allocation3], 1 }
0x1794   :  { %4115 = vsyncpa [#allocation3 + $0x1], 1 }

</bundles_post_ra>
